<compile_context>
chip_gen: v7x
topology: tpu7x:2x2x1
jax: 0.10.0
libtpu: 0.0.40
codegen_flags: <defaults>
</compile_context>

<pallas_src>
import jax
import jax.numpy as jnp
from jax.experimental import pallas as pl
from jax.experimental.pallas import tpu as pltpu


# ---------------------------------------------------------------------------
# Kernel helpers
# ---------------------------------------------------------------------------
def _fused_gru(x, hprev, wi_ref, wh_ref, bi_ref, bh_ref, d_h):
    """PyTorch GRUCell semantics with gate-fused weights.

    wi_ref: (d_in, 3*d_h), wh_ref: (d_h, 3*d_h), columns ordered [r | z | n].
    bi_ref/bh_ref: (1, 3*d_h).  Matmuls run in bf16 with f32 accumulation.
    """
    gi = jnp.dot(x.astype(jnp.bfloat16), wi_ref[...],
                 preferred_element_type=jnp.float32) + bi_ref[...]
    gh = jnp.dot(hprev.astype(jnp.bfloat16), wh_ref[...],
                 preferred_element_type=jnp.float32) + bh_ref[...]
    r = jax.nn.sigmoid(gi[:, 0:d_h] + gh[:, 0:d_h])
    z = jax.nn.sigmoid(gi[:, d_h:2 * d_h] + gh[:, d_h:2 * d_h])
    n = jnp.tanh(gi[:, 2 * d_h:3 * d_h] + r * gh[:, 2 * d_h:3 * d_h])
    return (1.0 - z) * n + z * hprev


# ---------------------------------------------------------------------------
# Kernel
# ---------------------------------------------------------------------------
def skt_kernel(
    ex_ids_ref,                                     # SMEM (B,) int32  (scalar prefetch)
    su_ref, h_ref, kci_ref, kcj_ref, wij_ref,       # per-batch-tile blocks
    wex0_ref, wex1_ref,                             # (n_ex, d_e) f32 embedding tables
    twi_ref, twh_ref, tbi_ref, tbh_ref,             # temporal GRU (fused gates)
    wfdt_ref, bmf_ref, wu_ref, bu_ref,              # fpart / ulinear
    uwi_ref, uwh_ref, ubi_ref, ubh_ref,             # update GRU (fused gates)
    out_ref,                                        # (TB, n_kc*d_h) f32
):
    TB = su_ref.shape[0]
    M, d_h = h_ref.shape
    n_kc = M // TB
    d_e = wex0_ref.shape[1]
    pid = pl.program_id(0)

    h = h_ref[...]          # (M, d_h), rows = (batch, kc)
    kci = kci_ref[...]      # (M, d_h), kci[b,i] pre-broadcast along d_h
    kcj = kcj_ref[...]      # (M, d_h)

    # --- exercise embedding: one-hot gather + su blend, replicated per KC row
    # TODO(synk): assumes `ex` is one-hot (integer exercise ids); a dense,
    # non-one-hot ex would need the original (TB, n_ex) @ (n_ex, d_e) matmuls.
    xb = []
    for b in range(TB):
        ex_id = ex_ids_ref[pid * TB + b]                          # SMEM scalar
        s = su_ref[b:b + 1, :]                                    # (1, 1)
        row = (s * wex0_ref[pl.ds(ex_id, 1), :]
               + (1.0 - s) * wex1_ref[pl.ds(ex_id, 1), :])        # (1, d_e)
        xb.append(jnp.broadcast_to(row, (n_kc, d_e)))
    x_rows = jnp.concatenate(xb, axis=0)                          # (M, d_e)

    # --- temporal GRU + kci blend
    tg = _fused_gru(x_rows, h, twi_ref, twh_ref, tbi_ref, tbh_ref, d_h)
    new_h = (1.0 - kci) * h + kci * tg
    delta_h = new_h - h

    # --- fpart hot path, lane-dense (M, n_kc*d_h):
    #     part[(b,i), (j,d)] = relu(a[b,i,d] + bm[j,d]) * kc_graph[i,j]*kci[b,i]
    # wfdt = W_fd tiled along columns -> one MXU dot with N = n_kc*d_h.
    part = jnp.dot(delta_h.astype(jnp.bfloat16), wfdt_ref[...],
                   preferred_element_type=jnp.float32) + bmf_ref[...]
    part = jnp.maximum(part, 0.0) * wij_ref[...]

    # reduce over source KC i (sublane groups of n_kc rows per batch element),
    # then re-tile each (1, n_kc*d_h) per-batch sum into rows = (batch, target j)
    pj = []
    for b in range(TB):
        sline = jnp.sum(part[b * n_kc:(b + 1) * n_kc, :], axis=0, keepdims=True)
        for j in range(n_kc):
            pj.append(sline[:, j * d_h:(j + 1) * d_h])
    partj = jnp.concatenate(pj, axis=0)                           # (M, d_h)

    # outj = relu(ulinear(partj))
    outj = jnp.maximum(
        jnp.dot(partj.astype(jnp.bfloat16), wu_ref[...],
                preferred_element_type=jnp.float32) + bu_ref[...],
        0.0)

    # --- update GRU + kcj blend
    ug = _fused_gru(outj, new_h, uwi_ref, uwh_ref, ubi_ref, ubh_ref, d_h)
    res = (1.0 - kcj) * new_h + kcj * ug                          # (M, d_h)

    # --- lane-dense store: rows (b, i) -> (TB, n_kc*d_h)
    flat_rows = []
    for b in range(TB):
        flat_rows.append(jnp.concatenate(
            [res[b * n_kc + i:b * n_kc + i + 1, :] for i in range(n_kc)],
            axis=1))
    out_ref[...] = jnp.concatenate(flat_rows, axis=0)


# ---------------------------------------------------------------------------
# Wrapper
# ---------------------------------------------------------------------------
def _pick_tb(batch, n_kc, target_rows=256):
    """Largest divisor of `batch` such that TB * n_kc <= target_rows (>= 1)."""
    cap = max(1, target_rows // max(1, n_kc))
    tb = min(batch, cap)
    while batch % tb != 0:
        tb -= 1
    return tb


def skt_cell_pallas(params, h, ex_ids, su):
    B, n_kc, d_h = h.shape
    n_ex, d_e = params["W_ex0"].shape
    f32, bf16 = jnp.float32, jnp.bfloat16
    hi = jax.lax.Precision.HIGHEST

    # --- tiny gating glue (O(B * n_kc^2) scalars) -----------------------------
    kc_graph = jax.nn.sigmoid(params["kc_gamma"])                  # (n_kc, n_kc)
    kci = params["ex_graph"][ex_ids]                               # (B, n_kc) == one_hot(ex) @ ex_graph
    kcj = jnp.dot(kci, kc_graph, precision=hi)                     # (B, n_kc)

    TB = _pick_tb(B, n_kc)
    G = B // TB

    # --- per-batch tensors, pre-broadcast / lane-dense ------------------------
    h_rows = h.reshape(B * n_kc, d_h).astype(f32)                  # rows = (b, kc)
    kci_rows = jnp.repeat(kci.reshape(B * n_kc, 1), d_h, axis=1).astype(f32)
    kcj_rows = jnp.repeat(kcj.reshape(B * n_kc, 1), d_h, axis=1).astype(f32)
    wij = (kci[:, :, None] * kc_graph[None, :, :]).reshape(B * n_kc, n_kc)
    wij_flat = jnp.repeat(wij, d_h, axis=1).astype(f32)            # (B*n_kc, n_kc*d_h)
    su2 = su.reshape(B, 1).astype(f32)

    # --- parameter folding / fusing -------------------------------------------
    # fpart([delta_h ; e]) = delta_h @ W_fd + (e_emb @ W_fe + b_f)
    bm = jnp.dot(params["e_emb"], params["W_fe"], precision=hi) + params["b_f"]
    bm_flat = bm.reshape(1, n_kc * d_h).astype(f32)                # lanes = (j, d)
    wfd_tiled = jnp.tile(params["W_fd"], (1, n_kc)).astype(bf16)   # (d_h, n_kc*d_h)

    per_tile = [su2, h_rows, kci_rows, kcj_rows, wij_flat]
    weights = [
        params["W_ex0"].astype(f32), params["W_ex1"].astype(f32),
        params["tW_i"].astype(bf16), params["tW_h"].astype(bf16),
        params["tb_i"].astype(f32), params["tb_h"].astype(f32),
        wfd_tiled, bm_flat,
        params["W_u"].astype(bf16), params["b_u"].astype(f32),
        params["uW_i"].astype(bf16), params["uW_h"].astype(bf16),
        params["ub_i"].astype(f32), params["ub_h"].astype(f32),
    ]

    def tile_spec(a):
        nd = a.ndim
        blk = (a.shape[0] // G,) + tuple(a.shape[1:])
        return pl.BlockSpec(blk, lambda g, *_: (g,) + (0,) * (nd - 1))

    def full_spec(a):
        nd = a.ndim
        return pl.BlockSpec(tuple(a.shape), lambda g, *_: (0,) * nd)

    grid_spec = pltpu.PrefetchScalarGridSpec(
        num_scalar_prefetch=1,
        grid=(G,),
        in_specs=[tile_spec(a) for a in per_tile] + [full_spec(a) for a in weights],
        out_specs=pl.BlockSpec((TB, n_kc * d_h), lambda g, *_: (g, 0)),
    )

    out_flat = pl.pallas_call(
        skt_kernel,
        out_shape=jax.ShapeDtypeStruct((B, n_kc * d_h), f32),
        grid_spec=grid_spec,
        compiler_params=pltpu.CompilerParams(dimension_semantics=("parallel",)),
    )(ex_ids.astype(jnp.int32), *per_tile, *weights)

    return out_flat.reshape(B, n_kc, d_h)


# ---------------------------------------------------------------------------
# Pure-JAX reference (same math as the PyTorch module, bf16 mirrored at the
# matmuls that the kernel runs in bf16 so the comparison isolates structure).
# ---------------------------------------------------------------------------
def _bdot(x, w):
    return jnp.dot(x.astype(jnp.bfloat16), w.astype(jnp.bfloat16),
                   preferred_element_type=jnp.float32)


def skt_cell_ref(p, h, ex, su):
    B, n_kc, d_h = h.shape
    hi = jax.lax.Precision.HIGHEST
    kc_graph = jax.nn.sigmoid(p["kc_gamma"])
    kci = jnp.dot(ex, p["ex_graph"], precision=hi)                 # (B, n_kc)
    kcj = jnp.dot(kci, kc_graph, precision=hi)
    x = (jnp.dot(ex * su[:, None], p["W_ex0"], precision=hi)
         + jnp.dot(ex * (1.0 - su[:, None]), p["W_ex1"], precision=hi))  # (B, d_e)

    def gru(xin, hin, Wi, Wh, bi, bh):
        gi = _bdot(xin, Wi) + bi
        gh = _bdot(hin, Wh) + bh
        r = jax.nn.sigmoid(gi[..., :d_h] + gh[..., :d_h])
        z = jax.nn.sigmoid(gi[..., d_h:2 * d_h] + gh[..., d_h:2 * d_h])
        n = jnp.tanh(gi[..., 2 * d_h:] + r * gh[..., 2 * d_h:])
        return (1.0 - z) * n + z * hin

    x_rows = jnp.broadcast_to(x[:, None, :], (B, n_kc, x.shape[-1]))
    tg = gru(x_rows, h, p["tW_i"], p["tW_h"], p["tb_i"], p["tb_h"])
    kci_e = kci[..., None]
    new_h = (1.0 - kci_e) * h + kci_e * tg
    delta = new_h - h

    a = _bdot(delta, p["W_fd"])                                    # (B, n_kc, d_h)
    bm = jnp.dot(p["e_emb"], p["W_fe"], precision=hi) + p["b_f"]   # (n_kc, d_h)
    part = jax.nn.relu(a[:, :, None, :] + bm[None, None, :, :])
    part = part * kc_graph[None, :, :, None] * kci[:, :, None, None]
    partj = part.sum(axis=1)                                       # (B, n_kc, d_h)
    outj = jax.nn.relu(_bdot(partj, p["W_u"]) + p["b_u"])
    ug = gru(outj, new_h, p["uW_i"], p["uW_h"], p["ub_i"], p["ub_h"])
    kcj_e = kcj[..., None]
    return (1.0 - kcj_e) * new_h + kcj_e * ug


# ---------------------------------------------------------------------------
# Deterministic synthetic parameters (same shapes as the torch module's
# parameters, stored pre-transposed and with GRU gates fused along columns).
# ---------------------------------------------------------------------------
def init_params(key, n_ex, n_kc, d_e, d_c, d_h):
    ks = jax.random.split(key, 18)
    s = 0.1
    p = {
        "kc_gamma": jax.random.normal(ks[0], (n_kc, n_kc)),
        "ex_graph": jax.random.uniform(ks[1], (n_ex, n_kc), minval=0.0, maxval=1.0),
        # ex_embeddings: Linear(2*n_ex -> d_e, no bias), split as [ex*su | ex*(1-su)]
        "W_ex0": s * jax.random.normal(ks[2], (n_ex, d_e)),
        "W_ex1": s * jax.random.normal(ks[3], (n_ex, d_e)),
        # kc_embeddings(eye(n_kc)) == W_kc^T -> (n_kc, d_c)
        "e_emb": s * jax.random.normal(ks[4], (n_kc, d_c)),
        # tgru = GRUCell(d_e, d_h): gate-fused weights, columns ordered [r|z|n]
        "tW_i": s * jax.random.normal(ks[5], (d_e, 3 * d_h)),
        "tW_h": s * jax.random.normal(ks[6], (d_h, 3 * d_h)),
        "tb_i": s * jax.random.normal(ks[7], (1, 3 * d_h)),
        "tb_h": s * jax.random.normal(ks[8], (1, 3 * d_h)),
        # fpart = Linear(d_h + d_c -> d_h), split into delta_h / e parts
        "W_fd": s * jax.random.normal(ks[9], (d_h, d_h)),
        "W_fe": s * jax.random.normal(ks[10], (d_c, d_h)),
        "b_f": s * jax.random.normal(ks[11], (1, d_h)),
        # ulinear = Linear(d_h -> d_h)
        "W_u": s * jax.random.normal(ks[12], (d_h, d_h)),
        "b_u": s * jax.random.normal(ks[13], (1, d_h)),
        # ugru = GRUCell(d_h, d_h): gate-fused, [r|z|n]
        "uW_i": s * jax.random.normal(ks[14], (d_h, 3 * d_h)),
        "uW_h": s * jax.random.normal(ks[15], (d_h, 3 * d_h)),
        "ub_i": s * jax.random.normal(ks[16], (1, 3 * d_h)),
        "ub_h": s * jax.random.normal(ks[17], (1, 3 * d_h)),
    }
    return jax.tree.map(lambda a: a.astype(jnp.float32), p)


if __name__ == "__main__":
    B, n_ex, n_kc, d_e, d_c, d_h = 2, 16, 8, 32, 16, 32

    key = jax.random.PRNGKey(0)
    kp, kh, ke = jax.random.split(key, 3)
    params = init_params(kp, n_ex, n_kc, d_e, d_c, d_h)

    h0 = (0.1 * jax.random.normal(kh, (B, n_kc, d_h))).astype(jnp.float32)
    ex_ids = jax.random.randint(ke, (B,), 0, n_ex)                 # one-hot exercise ids
    su = jnp.array([1.0, 0.0], dtype=jnp.float32)                  # (B,)

    out = jax.block_until_ready(skt_cell_pallas(params, h0, ex_ids, su))

    ex = jax.nn.one_hot(ex_ids, n_ex, dtype=jnp.float32)           # (B, n_ex)
    ref = skt_cell_ref(params, h0, ex, su)

    assert out.shape == (B, n_kc, d_h)
    assert bool(jnp.all(jnp.isfinite(out)))
    max_err = float(jnp.max(jnp.abs(out - ref)))
    assert max_err < 2e-3, f"mismatch vs reference: {max_err}"
    print("KERNEL_OK")
</pallas_src>

<mosaic_0001>
module attributes {stable_mosaic.version = 11 : i64} {
  func.func @skt_kernel(%arg0: i32, %arg1: memref<2xi32, #tpu.memory_space<smem>>, %arg2: memref<2x1xf32, #tpu.memory_space<vmem>>, %arg3: memref<16x32xf32, #tpu.memory_space<vmem>>, %arg4: memref<16x32xf32, #tpu.memory_space<vmem>>, %arg5: memref<16x32xf32, #tpu.memory_space<vmem>>, %arg6: memref<16x256xf32, #tpu.memory_space<vmem>>, %arg7: memref<16x32xf32, #tpu.memory_space<vmem>>, %arg8: memref<16x32xf32, #tpu.memory_space<vmem>>, %arg9: memref<32x96xbf16, #tpu.memory_space<vmem>>, %arg10: memref<32x96xbf16, #tpu.memory_space<vmem>>, %arg11: memref<1x96xf32, #tpu.memory_space<vmem>>, %arg12: memref<1x96xf32, #tpu.memory_space<vmem>>, %arg13: memref<32x256xbf16, #tpu.memory_space<vmem>>, %arg14: memref<1x256xf32, #tpu.memory_space<vmem>>, %arg15: memref<32x32xbf16, #tpu.memory_space<vmem>>, %arg16: memref<1x32xf32, #tpu.memory_space<vmem>>, %arg17: memref<32x96xbf16, #tpu.memory_space<vmem>>, %arg18: memref<32x96xbf16, #tpu.memory_space<vmem>>, %arg19: memref<1x96xf32, #tpu.memory_space<vmem>>, %arg20: memref<1x96xf32, #tpu.memory_space<vmem>>, %arg21: memref<2x256xf32, #tpu.memory_space<vmem>>) attributes {dimension_semantics = [#tpu.dimension_semantics<parallel>], iteration_bounds = array<i64: 1>, scalar_prefetch = 1 : i64, scratch_operands = 0 : i64, tpu.core_type = #tpu.core_type<tc>, window_params = [{transform_indices = @transform_0, window_bounds = array<i64: 2, 1>}, {transform_indices = @transform_1, window_bounds = array<i64: 16, 32>}, {transform_indices = @transform_2, window_bounds = array<i64: 16, 32>}, {transform_indices = @transform_3, window_bounds = array<i64: 16, 32>}, {transform_indices = @transform_4, window_bounds = array<i64: 16, 256>}, {pipeline_mode = #tpu.pipeline_mode<synchronous>, transform_indices = @transform_5, window_bounds = array<i64: 16, 32>}, {pipeline_mode = #tpu.pipeline_mode<synchronous>, transform_indices = @transform_6, window_bounds = array<i64: 16, 32>}, {pipeline_mode = #tpu.pipeline_mode<synchronous>, transform_indices = @transform_7, window_bounds = array<i64: 32, 96>}, {pipeline_mode = #tpu.pipeline_mode<synchronous>, transform_indices = @transform_8, window_bounds = array<i64: 32, 96>}, {pipeline_mode = #tpu.pipeline_mode<synchronous>, transform_indices = @transform_9, window_bounds = array<i64: 1, 96>}, {pipeline_mode = #tpu.pipeline_mode<synchronous>, transform_indices = @transform_10, window_bounds = array<i64: 1, 96>}, {pipeline_mode = #tpu.pipeline_mode<synchronous>, transform_indices = @transform_11, window_bounds = array<i64: 32, 256>}, {pipeline_mode = #tpu.pipeline_mode<synchronous>, transform_indices = @transform_12, window_bounds = array<i64: 1, 256>}, {pipeline_mode = #tpu.pipeline_mode<synchronous>, transform_indices = @transform_13, window_bounds = array<i64: 32, 32>}, {pipeline_mode = #tpu.pipeline_mode<synchronous>, transform_indices = @transform_14, window_bounds = array<i64: 1, 32>}, {pipeline_mode = #tpu.pipeline_mode<synchronous>, transform_indices = @transform_15, window_bounds = array<i64: 32, 96>}, {pipeline_mode = #tpu.pipeline_mode<synchronous>, transform_indices = @transform_16, window_bounds = array<i64: 32, 96>}, {pipeline_mode = #tpu.pipeline_mode<synchronous>, transform_indices = @transform_17, window_bounds = array<i64: 1, 96>}, {pipeline_mode = #tpu.pipeline_mode<synchronous>, transform_indices = @transform_18, window_bounds = array<i64: 1, 96>}, {transform_indices = @transform_19, window_bounds = array<i64: 2, 256>}]} {
    %c0 = arith.constant 0 : index
    %c0_0 = arith.constant 0 : index
    %0 = vector.load %arg3[%c0, %c0_0] : memref<16x32xf32, #tpu.memory_space<vmem>>, vector<16x32xf32>
    %c0_1 = arith.constant 0 : index
    %c0_2 = arith.constant 0 : index
    %1 = vector.load %arg4[%c0_1, %c0_2] : memref<16x32xf32, #tpu.memory_space<vmem>>, vector<16x32xf32>
    %c0_3 = arith.constant 0 : index
    %c0_4 = arith.constant 0 : index
    %2 = vector.load %arg5[%c0_3, %c0_4] : memref<16x32xf32, #tpu.memory_space<vmem>>, vector<16x32xf32>
    %c2_i32 = arith.constant 2 : i32
    %3 = arith.muli %arg0, %c2_i32 : i32
    %c0_i32 = arith.constant 0 : i32
    %4 = arith.addi %3, %c0_i32 : i32
    %5 = arith.index_cast %4 : i32 to index
    %6 = memref.load %arg1[%5] : memref<2xi32, #tpu.memory_space<smem>>
    %c0_5 = arith.constant 0 : index
    %c0_6 = arith.constant 0 : index
    %7 = vector.load %arg2[%c0_5, %c0_6] : memref<2x1xf32, #tpu.memory_space<vmem>>, vector<1x1xf32>
    %8 = arith.index_cast %6 : i32 to index
    %c0_7 = arith.constant 0 : index
    %9 = vector.load %arg7[%8, %c0_7] : memref<16x32xf32, #tpu.memory_space<vmem>>, vector<1x32xf32>
    %10 = vector.broadcast %7 : vector<1x1xf32> to vector<1x32xf32>
    %11 = arith.mulf %10, %9 : vector<1x32xf32>
    %cst = arith.constant 1.000000e+00 : f32
    %12 = vector.broadcast %cst : f32 to vector<1x1xf32>
    %13 = arith.subf %12, %7 : vector<1x1xf32>
    %14 = arith.index_cast %6 : i32 to index
    %c0_8 = arith.constant 0 : index
    %15 = vector.load %arg8[%14, %c0_8] : memref<16x32xf32, #tpu.memory_space<vmem>>, vector<1x32xf32>
    %16 = vector.broadcast %13 : vector<1x1xf32> to vector<1x32xf32>
    %17 = arith.mulf %16, %15 : vector<1x32xf32>
    %18 = arith.addf %11, %17 : vector<1x32xf32>
    %19 = vector.shape_cast %18 : vector<1x32xf32> to vector<1x32xf32>
    %20 = vector.broadcast %19 : vector<1x32xf32> to vector<8x32xf32>
    %c2_i32_9 = arith.constant 2 : i32
    %21 = arith.muli %arg0, %c2_i32_9 : i32
    %c1_i32 = arith.constant 1 : i32
    %22 = arith.addi %21, %c1_i32 : i32
    %23 = arith.index_cast %22 : i32 to index
    %24 = memref.load %arg1[%23] : memref<2xi32, #tpu.memory_space<smem>>
    %c1 = arith.constant 1 : index
    %c0_10 = arith.constant 0 : index
    %25 = vector.load %arg2[%c1, %c0_10] : memref<2x1xf32, #tpu.memory_space<vmem>>, vector<1x1xf32>
    %26 = arith.index_cast %24 : i32 to index
    %c0_11 = arith.constant 0 : index
    %27 = vector.load %arg7[%26, %c0_11] : memref<16x32xf32, #tpu.memory_space<vmem>>, vector<1x32xf32>
    %28 = vector.broadcast %25 : vector<1x1xf32> to vector<1x32xf32>
    %29 = arith.mulf %28, %27 : vector<1x32xf32>
    %cst_12 = arith.constant 1.000000e+00 : f32
    %30 = vector.broadcast %cst_12 : f32 to vector<1x1xf32>
    %31 = arith.subf %30, %25 : vector<1x1xf32>
    %32 = arith.index_cast %24 : i32 to index
    %c0_13 = arith.constant 0 : index
    %33 = vector.load %arg8[%32, %c0_13] : memref<16x32xf32, #tpu.memory_space<vmem>>, vector<1x32xf32>
    %34 = vector.broadcast %31 : vector<1x1xf32> to vector<1x32xf32>
    %35 = arith.mulf %34, %33 : vector<1x32xf32>
    %36 = arith.addf %29, %35 : vector<1x32xf32>
    %37 = vector.shape_cast %36 : vector<1x32xf32> to vector<1x32xf32>
    %38 = vector.broadcast %37 : vector<1x32xf32> to vector<8x32xf32>
    %39 = tpu.concatenate %20, %38 in 0 : vector<8x32xf32>, vector<8x32xf32> -> vector<16x32xf32>
    %40 = arith.truncf %39 : vector<16x32xf32> to vector<16x32xbf16>
    %c0_14 = arith.constant 0 : index
    %c0_15 = arith.constant 0 : index
    %41 = vector.load %arg9[%c0_14, %c0_15] : memref<32x96xbf16, #tpu.memory_space<vmem>>, vector<32x96xbf16>
    %cst_16 = arith.constant dense<0.000000e+00> : vector<16x96xf32>
    %42 = tpu.matmul %40, %41, %cst_16 {dimension_numbers = #tpu.dot_dimension_numbers<[1], [0], [0], [1], [0, 0, 1, 1], [], []>} : vector<16x32xbf16>, vector<32x96xbf16>, vector<16x96xf32> -> vector<16x96xf32>
    %c0_17 = arith.constant 0 : index
    %c0_18 = arith.constant 0 : index
    %43 = vector.load %arg11[%c0_17, %c0_18] : memref<1x96xf32, #tpu.memory_space<vmem>>, vector<1x96xf32>
    %44 = vector.broadcast %43 : vector<1x96xf32> to vector<16x96xf32>
    %45 = arith.addf %42, %44 : vector<16x96xf32>
    %46 = arith.truncf %0 : vector<16x32xf32> to vector<16x32xbf16>
    %c0_19 = arith.constant 0 : index
    %c0_20 = arith.constant 0 : index
    %47 = vector.load %arg10[%c0_19, %c0_20] : memref<32x96xbf16, #tpu.memory_space<vmem>>, vector<32x96xbf16>
    %cst_21 = arith.constant dense<0.000000e+00> : vector<16x96xf32>
    %48 = tpu.matmul %46, %47, %cst_21 {dimension_numbers = #tpu.dot_dimension_numbers<[1], [0], [0], [1], [0, 0, 1, 1], [], []>} : vector<16x32xbf16>, vector<32x96xbf16>, vector<16x96xf32> -> vector<16x96xf32>
    %c0_22 = arith.constant 0 : index
    %c0_23 = arith.constant 0 : index
    %49 = vector.load %arg12[%c0_22, %c0_23] : memref<1x96xf32, #tpu.memory_space<vmem>>, vector<1x96xf32>
    %50 = vector.broadcast %49 : vector<1x96xf32> to vector<16x96xf32>
    %51 = arith.addf %48, %50 : vector<16x96xf32>
    %52 = vector.extract_strided_slice %45 {offsets = [0, 0], sizes = [16, 32], strides = [1, 1]} : vector<16x96xf32> to vector<16x32xf32>
    %53 = vector.extract_strided_slice %51 {offsets = [0, 0], sizes = [16, 32], strides = [1, 1]} : vector<16x96xf32> to vector<16x32xf32>
    %54 = arith.addf %52, %53 : vector<16x32xf32>
    %55 = arith.negf %54 : vector<16x32xf32>
    %56 = math.exp %55 : vector<16x32xf32>
    %cst_24 = arith.constant 1.000000e+00 : f32
    %57 = vector.broadcast %cst_24 : f32 to vector<16x32xf32>
    %58 = arith.addf %57, %56 : vector<16x32xf32>
    %59 = arith.divf %57, %58 : vector<16x32xf32>
    %60 = vector.extract_strided_slice %45 {offsets = [0, 32], sizes = [16, 32], strides = [1, 1]} : vector<16x96xf32> to vector<16x32xf32>
    %61 = vector.extract_strided_slice %51 {offsets = [0, 32], sizes = [16, 32], strides = [1, 1]} : vector<16x96xf32> to vector<16x32xf32>
    %62 = arith.addf %60, %61 : vector<16x32xf32>
    %63 = arith.negf %62 : vector<16x32xf32>
    %64 = math.exp %63 : vector<16x32xf32>
    %cst_25 = arith.constant 1.000000e+00 : f32
    %65 = vector.broadcast %cst_25 : f32 to vector<16x32xf32>
    %66 = arith.addf %65, %64 : vector<16x32xf32>
    %67 = arith.divf %65, %66 : vector<16x32xf32>
    %68 = vector.extract_strided_slice %45 {offsets = [0, 64], sizes = [16, 32], strides = [1, 1]} : vector<16x96xf32> to vector<16x32xf32>
    %69 = vector.extract_strided_slice %51 {offsets = [0, 64], sizes = [16, 32], strides = [1, 1]} : vector<16x96xf32> to vector<16x32xf32>
    %70 = arith.mulf %59, %69 : vector<16x32xf32>
    %71 = arith.addf %68, %70 : vector<16x32xf32>
    %72 = math.tanh %71 : vector<16x32xf32>
    %cst_26 = arith.constant 1.000000e+00 : f32
    %73 = vector.broadcast %cst_26 : f32 to vector<16x32xf32>
    %74 = arith.subf %73, %67 : vector<16x32xf32>
    %75 = arith.mulf %74, %72 : vector<16x32xf32>
    %76 = arith.mulf %67, %0 : vector<16x32xf32>
    %77 = arith.addf %75, %76 : vector<16x32xf32>
    %cst_27 = arith.constant 1.000000e+00 : f32
    %78 = vector.broadcast %cst_27 : f32 to vector<16x32xf32>
    %79 = arith.subf %78, %1 : vector<16x32xf32>
    %80 = arith.mulf %79, %0 : vector<16x32xf32>
    %81 = arith.mulf %1, %77 : vector<16x32xf32>
    %82 = arith.addf %80, %81 : vector<16x32xf32>
    %83 = arith.subf %82, %0 : vector<16x32xf32>
    %84 = arith.truncf %83 : vector<16x32xf32> to vector<16x32xbf16>
    %c0_28 = arith.constant 0 : index
    %c0_29 = arith.constant 0 : index
    %85 = vector.load %arg13[%c0_28, %c0_29] : memref<32x256xbf16, #tpu.memory_space<vmem>>, vector<32x256xbf16>
    %cst_30 = arith.constant dense<0.000000e+00> : vector<16x256xf32>
    %86 = tpu.matmul %84, %85, %cst_30 {dimension_numbers = #tpu.dot_dimension_numbers<[1], [0], [0], [1], [0, 0, 1, 1], [], []>} : vector<16x32xbf16>, vector<32x256xbf16>, vector<16x256xf32> -> vector<16x256xf32>
    %c0_31 = arith.constant 0 : index
    %c0_32 = arith.constant 0 : index
    %87 = vector.load %arg14[%c0_31, %c0_32] : memref<1x256xf32, #tpu.memory_space<vmem>>, vector<1x256xf32>
    %88 = vector.broadcast %87 : vector<1x256xf32> to vector<16x256xf32>
    %89 = arith.addf %86, %88 : vector<16x256xf32>
    %cst_33 = arith.constant 0.000000e+00 : f32
    %90 = vector.broadcast %cst_33 : f32 to vector<16x256xf32>
    %91 = arith.maximumf %89, %90 : vector<16x256xf32>
    %c0_34 = arith.constant 0 : index
    %c0_35 = arith.constant 0 : index
    %92 = vector.load %arg6[%c0_34, %c0_35] : memref<16x256xf32, #tpu.memory_space<vmem>>, vector<16x256xf32>
    %93 = arith.mulf %91, %92 : vector<16x256xf32>
    %94 = vector.extract_strided_slice %93 {offsets = [0, 0], sizes = [8, 256], strides = [1, 1]} : vector<16x256xf32> to vector<8x256xf32>
    %cst_36 = arith.constant dense<0.000000e+00> : vector<256xf32>
    %95 = vector.multi_reduction <add>, %94, %cst_36 [0] : vector<8x256xf32> to vector<256xf32>
    %96 = vector.shape_cast %95 : vector<256xf32> to vector<1x256xf32>
    %97 = vector.extract_strided_slice %96 {offsets = [0, 0], sizes = [1, 32], strides = [1, 1]} : vector<1x256xf32> to vector<1x32xf32>
    %98 = vector.extract_strided_slice %96 {offsets = [0, 32], sizes = [1, 32], strides = [1, 1]} : vector<1x256xf32> to vector<1x32xf32>
    %99 = vector.extract_strided_slice %96 {offsets = [0, 64], sizes = [1, 32], strides = [1, 1]} : vector<1x256xf32> to vector<1x32xf32>
    %100 = vector.extract_strided_slice %96 {offsets = [0, 96], sizes = [1, 32], strides = [1, 1]} : vector<1x256xf32> to vector<1x32xf32>
    %101 = vector.extract_strided_slice %96 {offsets = [0, 128], sizes = [1, 32], strides = [1, 1]} : vector<1x256xf32> to vector<1x32xf32>
    %102 = vector.extract_strided_slice %96 {offsets = [0, 160], sizes = [1, 32], strides = [1, 1]} : vector<1x256xf32> to vector<1x32xf32>
    %103 = vector.extract_strided_slice %96 {offsets = [0, 192], sizes = [1, 32], strides = [1, 1]} : vector<1x256xf32> to vector<1x32xf32>
    %104 = vector.extract_strided_slice %96 {offsets = [0, 224], sizes = [1, 32], strides = [1, 1]} : vector<1x256xf32> to vector<1x32xf32>
    %105 = vector.extract_strided_slice %93 {offsets = [8, 0], sizes = [8, 256], strides = [1, 1]} : vector<16x256xf32> to vector<8x256xf32>
    %cst_37 = arith.constant dense<0.000000e+00> : vector<256xf32>
    %106 = vector.multi_reduction <add>, %105, %cst_37 [0] : vector<8x256xf32> to vector<256xf32>
    %107 = vector.shape_cast %106 : vector<256xf32> to vector<1x256xf32>
    %108 = vector.extract_strided_slice %107 {offsets = [0, 0], sizes = [1, 32], strides = [1, 1]} : vector<1x256xf32> to vector<1x32xf32>
    %109 = vector.extract_strided_slice %107 {offsets = [0, 32], sizes = [1, 32], strides = [1, 1]} : vector<1x256xf32> to vector<1x32xf32>
    %110 = vector.extract_strided_slice %107 {offsets = [0, 64], sizes = [1, 32], strides = [1, 1]} : vector<1x256xf32> to vector<1x32xf32>
    %111 = vector.extract_strided_slice %107 {offsets = [0, 96], sizes = [1, 32], strides = [1, 1]} : vector<1x256xf32> to vector<1x32xf32>
    %112 = vector.extract_strided_slice %107 {offsets = [0, 128], sizes = [1, 32], strides = [1, 1]} : vector<1x256xf32> to vector<1x32xf32>
    %113 = vector.extract_strided_slice %107 {offsets = [0, 160], sizes = [1, 32], strides = [1, 1]} : vector<1x256xf32> to vector<1x32xf32>
    %114 = vector.extract_strided_slice %107 {offsets = [0, 192], sizes = [1, 32], strides = [1, 1]} : vector<1x256xf32> to vector<1x32xf32>
    %115 = vector.extract_strided_slice %107 {offsets = [0, 224], sizes = [1, 32], strides = [1, 1]} : vector<1x256xf32> to vector<1x32xf32>
    %116 = tpu.concatenate %97, %98, %99, %100, %101, %102, %103, %104, %108, %109, %110, %111, %112, %113, %114, %115 in 0 : vector<1x32xf32>, vector<1x32xf32>, vector<1x32xf32>, vector<1x32xf32>, vector<1x32xf32>, vector<1x32xf32>, vector<1x32xf32>, vector<1x32xf32>, vector<1x32xf32>, vector<1x32xf32>, vector<1x32xf32>, vector<1x32xf32>, vector<1x32xf32>, vector<1x32xf32>, vector<1x32xf32>, vector<1x32xf32> -> vector<16x32xf32>
    %117 = arith.truncf %116 : vector<16x32xf32> to vector<16x32xbf16>
    %c0_38 = arith.constant 0 : index
    %c0_39 = arith.constant 0 : index
    %118 = vector.load %arg15[%c0_38, %c0_39] : memref<32x32xbf16, #tpu.memory_space<vmem>>, vector<32x32xbf16>
    %cst_40 = arith.constant dense<0.000000e+00> : vector<16x32xf32>
    %119 = tpu.matmul %117, %118, %cst_40 {dimension_numbers = #tpu.dot_dimension_numbers<[1], [0], [0], [1], [0, 0, 1, 1], [], []>} : vector<16x32xbf16>, vector<32x32xbf16>, vector<16x32xf32> -> vector<16x32xf32>
    %c0_41 = arith.constant 0 : index
    %c0_42 = arith.constant 0 : index
    %120 = vector.load %arg16[%c0_41, %c0_42] : memref<1x32xf32, #tpu.memory_space<vmem>>, vector<1x32xf32>
    %121 = vector.broadcast %120 : vector<1x32xf32> to vector<16x32xf32>
    %122 = arith.addf %119, %121 : vector<16x32xf32>
    %cst_43 = arith.constant 0.000000e+00 : f32
    %123 = vector.broadcast %cst_43 : f32 to vector<16x32xf32>
    %124 = arith.maximumf %122, %123 : vector<16x32xf32>
    %125 = arith.truncf %124 : vector<16x32xf32> to vector<16x32xbf16>
    %c0_44 = arith.constant 0 : index
    %c0_45 = arith.constant 0 : index
    %126 = vector.load %arg17[%c0_44, %c0_45] : memref<32x96xbf16, #tpu.memory_space<vmem>>, vector<32x96xbf16>
    %cst_46 = arith.constant dense<0.000000e+00> : vector<16x96xf32>
    %127 = tpu.matmul %125, %126, %cst_46 {dimension_numbers = #tpu.dot_dimension_numbers<[1], [0], [0], [1], [0, 0, 1, 1], [], []>} : vector<16x32xbf16>, vector<32x96xbf16>, vector<16x96xf32> -> vector<16x96xf32>
    %c0_47 = arith.constant 0 : index
    %c0_48 = arith.constant 0 : index
    %128 = vector.load %arg19[%c0_47, %c0_48] : memref<1x96xf32, #tpu.memory_space<vmem>>, vector<1x96xf32>
    %129 = vector.broadcast %128 : vector<1x96xf32> to vector<16x96xf32>
    %130 = arith.addf %127, %129 : vector<16x96xf32>
    %131 = arith.truncf %82 : vector<16x32xf32> to vector<16x32xbf16>
    %c0_49 = arith.constant 0 : index
    %c0_50 = arith.constant 0 : index
    %132 = vector.load %arg18[%c0_49, %c0_50] : memref<32x96xbf16, #tpu.memory_space<vmem>>, vector<32x96xbf16>
    %cst_51 = arith.constant dense<0.000000e+00> : vector<16x96xf32>
    %133 = tpu.matmul %131, %132, %cst_51 {dimension_numbers = #tpu.dot_dimension_numbers<[1], [0], [0], [1], [0, 0, 1, 1], [], []>} : vector<16x32xbf16>, vector<32x96xbf16>, vector<16x96xf32> -> vector<16x96xf32>
    %c0_52 = arith.constant 0 : index
    %c0_53 = arith.constant 0 : index
    %134 = vector.load %arg20[%c0_52, %c0_53] : memref<1x96xf32, #tpu.memory_space<vmem>>, vector<1x96xf32>
    %135 = vector.broadcast %134 : vector<1x96xf32> to vector<16x96xf32>
    %136 = arith.addf %133, %135 : vector<16x96xf32>
    %137 = vector.extract_strided_slice %130 {offsets = [0, 0], sizes = [16, 32], strides = [1, 1]} : vector<16x96xf32> to vector<16x32xf32>
    %138 = vector.extract_strided_slice %136 {offsets = [0, 0], sizes = [16, 32], strides = [1, 1]} : vector<16x96xf32> to vector<16x32xf32>
    %139 = arith.addf %137, %138 : vector<16x32xf32>
    %140 = arith.negf %139 : vector<16x32xf32>
    %141 = math.exp %140 : vector<16x32xf32>
    %cst_54 = arith.constant 1.000000e+00 : f32
    %142 = vector.broadcast %cst_54 : f32 to vector<16x32xf32>
    %143 = arith.addf %142, %141 : vector<16x32xf32>
    %144 = arith.divf %142, %143 : vector<16x32xf32>
    %145 = vector.extract_strided_slice %130 {offsets = [0, 32], sizes = [16, 32], strides = [1, 1]} : vector<16x96xf32> to vector<16x32xf32>
    %146 = vector.extract_strided_slice %136 {offsets = [0, 32], sizes = [16, 32], strides = [1, 1]} : vector<16x96xf32> to vector<16x32xf32>
    %147 = arith.addf %145, %146 : vector<16x32xf32>
    %148 = arith.negf %147 : vector<16x32xf32>
    %149 = math.exp %148 : vector<16x32xf32>
    %cst_55 = arith.constant 1.000000e+00 : f32
    %150 = vector.broadcast %cst_55 : f32 to vector<16x32xf32>
    %151 = arith.addf %150, %149 : vector<16x32xf32>
    %152 = arith.divf %150, %151 : vector<16x32xf32>
    %153 = vector.extract_strided_slice %130 {offsets = [0, 64], sizes = [16, 32], strides = [1, 1]} : vector<16x96xf32> to vector<16x32xf32>
    %154 = vector.extract_strided_slice %136 {offsets = [0, 64], sizes = [16, 32], strides = [1, 1]} : vector<16x96xf32> to vector<16x32xf32>
    %155 = arith.mulf %144, %154 : vector<16x32xf32>
    %156 = arith.addf %153, %155 : vector<16x32xf32>
    %157 = math.tanh %156 : vector<16x32xf32>
    %cst_56 = arith.constant 1.000000e+00 : f32
    %158 = vector.broadcast %cst_56 : f32 to vector<16x32xf32>
    %159 = arith.subf %158, %152 : vector<16x32xf32>
    %160 = arith.mulf %159, %157 : vector<16x32xf32>
    %161 = arith.mulf %152, %82 : vector<16x32xf32>
    %162 = arith.addf %160, %161 : vector<16x32xf32>
    %cst_57 = arith.constant 1.000000e+00 : f32
    %163 = vector.broadcast %cst_57 : f32 to vector<16x32xf32>
    %164 = arith.subf %163, %2 : vector<16x32xf32>
    %165 = arith.mulf %164, %82 : vector<16x32xf32>
    %166 = arith.mulf %2, %162 : vector<16x32xf32>
    %167 = arith.addf %165, %166 : vector<16x32xf32>
    %168 = vector.extract_strided_slice %167 {offsets = [0, 0], sizes = [1, 32], strides = [1, 1]} : vector<16x32xf32> to vector<1x32xf32>
    %169 = vector.extract_strided_slice %167 {offsets = [1, 0], sizes = [1, 32], strides = [1, 1]} : vector<16x32xf32> to vector<1x32xf32>
    %170 = vector.extract_strided_slice %167 {offsets = [2, 0], sizes = [1, 32], strides = [1, 1]} : vector<16x32xf32> to vector<1x32xf32>
    %171 = vector.extract_strided_slice %167 {offsets = [3, 0], sizes = [1, 32], strides = [1, 1]} : vector<16x32xf32> to vector<1x32xf32>
    %172 = vector.extract_strided_slice %167 {offsets = [4, 0], sizes = [1, 32], strides = [1, 1]} : vector<16x32xf32> to vector<1x32xf32>
    %173 = vector.extract_strided_slice %167 {offsets = [5, 0], sizes = [1, 32], strides = [1, 1]} : vector<16x32xf32> to vector<1x32xf32>
    %174 = vector.extract_strided_slice %167 {offsets = [6, 0], sizes = [1, 32], strides = [1, 1]} : vector<16x32xf32> to vector<1x32xf32>
    %175 = vector.extract_strided_slice %167 {offsets = [7, 0], sizes = [1, 32], strides = [1, 1]} : vector<16x32xf32> to vector<1x32xf32>
    %176 = tpu.concatenate %168, %169, %170, %171, %172, %173, %174, %175 in 1 : vector<1x32xf32>, vector<1x32xf32>, vector<1x32xf32>, vector<1x32xf32>, vector<1x32xf32>, vector<1x32xf32>, vector<1x32xf32>, vector<1x32xf32> -> vector<1x256xf32>
    %177 = vector.extract_strided_slice %167 {offsets = [8, 0], sizes = [1, 32], strides = [1, 1]} : vector<16x32xf32> to vector<1x32xf32>
    %178 = vector.extract_strided_slice %167 {offsets = [9, 0], sizes = [1, 32], strides = [1, 1]} : vector<16x32xf32> to vector<1x32xf32>
    %179 = vector.extract_strided_slice %167 {offsets = [10, 0], sizes = [1, 32], strides = [1, 1]} : vector<16x32xf32> to vector<1x32xf32>
    %180 = vector.extract_strided_slice %167 {offsets = [11, 0], sizes = [1, 32], strides = [1, 1]} : vector<16x32xf32> to vector<1x32xf32>
    %181 = vector.extract_strided_slice %167 {offsets = [12, 0], sizes = [1, 32], strides = [1, 1]} : vector<16x32xf32> to vector<1x32xf32>
    %182 = vector.extract_strided_slice %167 {offsets = [13, 0], sizes = [1, 32], strides = [1, 1]} : vector<16x32xf32> to vector<1x32xf32>
    %183 = vector.extract_strided_slice %167 {offsets = [14, 0], sizes = [1, 32], strides = [1, 1]} : vector<16x32xf32> to vector<1x32xf32>
    %184 = vector.extract_strided_slice %167 {offsets = [15, 0], sizes = [1, 32], strides = [1, 1]} : vector<16x32xf32> to vector<1x32xf32>
    %185 = tpu.concatenate %177, %178, %179, %180, %181, %182, %183, %184 in 1 : vector<1x32xf32>, vector<1x32xf32>, vector<1x32xf32>, vector<1x32xf32>, vector<1x32xf32>, vector<1x32xf32>, vector<1x32xf32>, vector<1x32xf32> -> vector<1x256xf32>
    %186 = tpu.concatenate %176, %185 in 0 : vector<1x256xf32>, vector<1x256xf32> -> vector<2x256xf32>
    %c0_58 = arith.constant 0 : index
    %c0_59 = arith.constant 0 : index
    %187 = vector.load %arg21[%c0_58, %c0_59] : memref<2x256xf32, #tpu.memory_space<vmem>>, vector<2x256xf32>
    tpu.vector_store %arg21[%c0_58, %c0_59], %186 {strides = array<i32>} : memref<2x256xf32, #tpu.memory_space<vmem>>, vector<2x256xf32>,
    return
  }
  func.func @transform_0(%arg0: i32, %arg1: memref<2xi32, #tpu.memory_space<smem>>) -> (i32, i32) {
    %c0_i32 = arith.constant 0 : i32
    %c0_i32_0 = arith.constant 0 : i32
    return %arg0, %c0_i32 : i32, i32
  }
  func.func @transform_1(%arg0: i32, %arg1: memref<2xi32, #tpu.memory_space<smem>>) -> (i32, i32) {
    %c0_i32 = arith.constant 0 : i32
    %c0_i32_0 = arith.constant 0 : i32
    return %arg0, %c0_i32 : i32, i32
  }
  func.func @transform_2(%arg0: i32, %arg1: memref<2xi32, #tpu.memory_space<smem>>) -> (i32, i32) {
    %c0_i32 = arith.constant 0 : i32
    %c0_i32_0 = arith.constant 0 : i32
    return %arg0, %c0_i32 : i32, i32
  }
  func.func @transform_3(%arg0: i32, %arg1: memref<2xi32, #tpu.memory_space<smem>>) -> (i32, i32) {
    %c0_i32 = arith.constant 0 : i32
    %c0_i32_0 = arith.constant 0 : i32
    return %arg0, %c0_i32 : i32, i32
  }
  func.func @transform_4(%arg0: i32, %arg1: memref<2xi32, #tpu.memory_space<smem>>) -> (i32, i32) {
    %c0_i32 = arith.constant 0 : i32
    %c0_i32_0 = arith.constant 0 : i32
    return %arg0, %c0_i32 : i32, i32
  }
  func.func @transform_5(%arg0: i32, %arg1: memref<2xi32, #tpu.memory_space<smem>>) -> (i32, i32) {
    %c0_i32 = arith.constant 0 : i32
    %c0_i32_0 = arith.constant 0 : i32
    %c0_i32_1 = arith.constant 0 : i32
    return %c0_i32, %c0_i32_0 : i32, i32
  }
  func.func @transform_6(%arg0: i32, %arg1: memref<2xi32, #tpu.memory_space<smem>>) -> (i32, i32) {
    %c0_i32 = arith.constant 0 : i32
    %c0_i32_0 = arith.constant 0 : i32
    %c0_i32_1 = arith.constant 0 : i32
    return %c0_i32, %c0_i32_0 : i32, i32
  }
  func.func @transform_7(%arg0: i32, %arg1: memref<2xi32, #tpu.memory_space<smem>>) -> (i32, i32) {
    %c0_i32 = arith.constant 0 : i32
    %c0_i32_0 = arith.constant 0 : i32
    %c0_i32_1 = arith.constant 0 : i32
    return %c0_i32, %c0_i32_0 : i32, i32
  }
  func.func @transform_8(%arg0: i32, %arg1: memref<2xi32, #tpu.memory_space<smem>>) -> (i32, i32) {
    %c0_i32 = arith.constant 0 : i32
    %c0_i32_0 = arith.constant 0 : i32
    %c0_i32_1 = arith.constant 0 : i32
    return %c0_i32, %c0_i32_0 : i32, i32
  }
  func.func @transform_9(%arg0: i32, %arg1: memref<2xi32, #tpu.memory_space<smem>>) -> (i32, i32) {
    %c0_i32 = arith.constant 0 : i32
    %c0_i32_0 = arith.constant 0 : i32
    %c0_i32_1 = arith.constant 0 : i32
    return %c0_i32, %c0_i32_0 : i32, i32
  }
  func.func @transform_10(%arg0: i32, %arg1: memref<2xi32, #tpu.memory_space<smem>>) -> (i32, i32) {
    %c0_i32 = arith.constant 0 : i32
    %c0_i32_0 = arith.constant 0 : i32
    %c0_i32_1 = arith.constant 0 : i32
    return %c0_i32, %c0_i32_0 : i32, i32
  }
  func.func @transform_11(%arg0: i32, %arg1: memref<2xi32, #tpu.memory_space<smem>>) -> (i32, i32) {
    %c0_i32 = arith.constant 0 : i32
    %c0_i32_0 = arith.constant 0 : i32
    %c0_i32_1 = arith.constant 0 : i32
    return %c0_i32, %c0_i32_0 : i32, i32
  }
  func.func @transform_12(%arg0: i32, %arg1: memref<2xi32, #tpu.memory_space<smem>>) -> (i32, i32) {
    %c0_i32 = arith.constant 0 : i32
    %c0_i32_0 = arith.constant 0 : i32
    %c0_i32_1 = arith.constant 0 : i32
    return %c0_i32, %c0_i32_0 : i32, i32
  }
  func.func @transform_13(%arg0: i32, %arg1: memref<2xi32, #tpu.memory_space<smem>>) -> (i32, i32) {
    %c0_i32 = arith.constant 0 : i32
    %c0_i32_0 = arith.constant 0 : i32
    %c0_i32_1 = arith.constant 0 : i32
    return %c0_i32, %c0_i32_0 : i32, i32
  }
  func.func @transform_14(%arg0: i32, %arg1: memref<2xi32, #tpu.memory_space<smem>>) -> (i32, i32) {
    %c0_i32 = arith.constant 0 : i32
    %c0_i32_0 = arith.constant 0 : i32
    %c0_i32_1 = arith.constant 0 : i32
    return %c0_i32, %c0_i32_0 : i32, i32
  }
  func.func @transform_15(%arg0: i32, %arg1: memref<2xi32, #tpu.memory_space<smem>>) -> (i32, i32) {
    %c0_i32 = arith.constant 0 : i32
    %c0_i32_0 = arith.constant 0 : i32
    %c0_i32_1 = arith.constant 0 : i32
    return %c0_i32, %c0_i32_0 : i32, i32
  }
  func.func @transform_16(%arg0: i32, %arg1: memref<2xi32, #tpu.memory_space<smem>>) -> (i32, i32) {
    %c0_i32 = arith.constant 0 : i32
    %c0_i32_0 = arith.constant 0 : i32
    %c0_i32_1 = arith.constant 0 : i32
    return %c0_i32, %c0_i32_0 : i32, i32
  }
  func.func @transform_17(%arg0: i32, %arg1: memref<2xi32, #tpu.memory_space<smem>>) -> (i32, i32) {
    %c0_i32 = arith.constant 0 : i32
    %c0_i32_0 = arith.constant 0 : i32
    %c0_i32_1 = arith.constant 0 : i32
    return %c0_i32, %c0_i32_0 : i32, i32
  }
  func.func @transform_18(%arg0: i32, %arg1: memref<2xi32, #tpu.memory_space<smem>>) -> (i32, i32) {
    %c0_i32 = arith.constant 0 : i32
    %c0_i32_0 = arith.constant 0 : i32
    %c0_i32_1 = arith.constant 0 : i32
    return %c0_i32, %c0_i32_0 : i32, i32
  }
  func.func @transform_19(%arg0: i32, %arg1: memref<2xi32, #tpu.memory_space<smem>>) -> (i32, i32) {
    %c0_i32 = arith.constant 0 : i32
    %c0_i32_0 = arith.constant 0 : i32
    return %arg0, %c0_i32 : i32, i32
  }
}

</mosaic_0001>

<bundles_post_ra>
// kernel: tpu_custom_call.1
= control target key start
LH: loop header
LB: loop body
LE: loop exit
PB: predicated region body
PF: predicated region fallthrough
CT: control target
= control target key end

     0   :  { %s2108_s0 = inlined_call_operand.hbm [shape: s32[2], index: 0, kind: input, shape index: {}]   ;;  %s2109_s1 = inlined_call_operand.vmem [shape: f32[2,1], index: 1, kind: input, shape index: {}]   ;;  %s2110_s2 = inlined_call_operand.hbm [shape: f32[16,32], index: 2, kind: input, shape index: {}]   ;;  %s2111_s3 = inlined_call_operand.hbm [shape: f32[16,32], index: 3, kind: input, shape index: {}]   ;;  %s2112_s4 = inlined_call_operand.vmem [shape: f32[16,32], index: 4, kind: input, shape index: {}]   ;;  %s2113_s5 = inlined_call_operand.hbm [shape: f32[16,256], index: 5, kind: input, shape index: {}]   ;;  %s2114_s6 = inlined_call_operand.hbm [shape: f32[16,32], index: 6, kind: input, shape index: {}]   ;;  %s2115_s7 = inlined_call_operand.hbm [shape: f32[16,32], index: 7, kind: input, shape index: {}]   ;;  %s2116_s8 = inlined_call_operand.hbm [shape: bf16[32,96], index: 8, kind: input, shape index: {}]   ;;  %s2117_s9 = inlined_call_operand.hbm [shape: bf16[32,96], index: 9, kind: input, shape index: {}]   ;;  %s2118_s10 = inlined_call_operand.hbm [shape: f32[1,96], index: 10, kind: input, shape index: {}]   ;;  %s2119_s11 = inlined_call_operand.hbm [shape: f32[1,96], index: 11, kind: input, shape index: {}]   ;;  %s2120_s12 = inlined_call_operand.vmem [shape: bf16[32,256], index: 12, kind: input, shape index: {}]   ;;  %s2121_s13 = inlined_call_operand.hbm [shape: f32[1,256], index: 13, kind: input, shape index: {}]   ;;  %s2122_s14 = inlined_call_operand.hbm [shape: bf16[32,32], index: 14, kind: input, shape index: {}]   ;;  %s2123_s15 = inlined_call_operand.hbm [shape: f32[1,32], index: 15, kind: input, shape index: {}]   ;;  %s2124_s16 = inlined_call_operand.vmem [shape: bf16[32,96], index: 16, kind: input, shape index: {}]   ;;  %s2125_s17 = inlined_call_operand.hbm [shape: bf16[32,96], index: 17, kind: input, shape index: {}]   ;;  %s2126_s18 = inlined_call_operand.vmem [shape: f32[1,96], index: 18, kind: input, shape index: {}]   ;;  %s2127_s19 = inlined_call_operand.vmem [shape: f32[1,96], index: 19, kind: input, shape index: {}]   ;;  %s2128_s20 = inlined_call_operand.hbm [shape: f32[2,256], index: 20, kind: output, shape index: {}]  }
   0x1   :  { %2137 = sst [smem:[#allocation35_spill]] %s2108_s0 }
   0x2   :  { %2138 = sst [smem:[#allocation36_spill]] %s2109_s1  ;;  %s2143_s23 = sld [smem:[#allocation35_spill]] }
   0x3   :  { %2139 = sst [smem:[#allocation37_spill]] %s2110_s2 }
   0x4   :  { %2140 = sst [smem:[#allocation38_spill]] %s2111_s3 }
   0x5   :  { %2141 = sst [smem:[#allocation39_spill]] %s2112_s4 }
   0x6   :  { %2142 = sst [smem:[#allocation40_spill]] %s2120_s12 }
   0x8   :  { %s1267_s12 = scalar_lea.hbm %s2143_s23, 16 }
   0x9   :  { %p1268_p0 = scmp.ne.s32.totalorder %s2143_s23, %s1267_s12  ;;  %p1271_p1 = scmp.lt.u32.totalorder %s1267_s12, %s2143_s23 }
   0xb   :  { %p1273_p2 = pnand %p1271_p1, %p1268_p0 }
   0xd   :  { %1276 = shalt.err (!%p1273_p2)  }
   0xe   :  { %s1603_s26 = smov [#allocation3]  }
   0xf   :  { %26 = dma.hbm_to_smem %s2143_s23, 16, %s1603_s26, [#allocation2] }
  0x10   :  { %1585 = dma.done.wait [#allocation2], 16 }
  0x11   :  { %1586 = vsyncadd [#allocation2], 4294967280 }
  0x12   :  { %28 = sfence }
  0x13   :  { %29 = vsyncpa [#allocation5], 0 }
  0x14   :  { %30 = vsyncpa [#allocation8], 0 }
  0x15   :  { %31 = vsyncpa [#allocation11], 0 }
  0x16   :  { %32 = vsyncpa [#allocation14], 0 }
  0x17   :  { %33 = vsyncpa [#allocation17], 0 }
  0x18   :  { %34 = vsyncpa [#allocation20], 0 }
  0x19   :  { %35 = vsyncpa [#allocation23], 0 }
  0x1a   :  { %36 = vsyncpa [#allocation6], 0  ;;  %s1604_s4 = smov [#allocation7]   ;;  %s1605_s29 = smov [#allocation10]  }
  0x1b   :  { %s56_s12 = sshll.u32 %s1604_s4, 4  ;;  %s82_s30 = sshll.u32 %s1605_s29, 4  ;;  %s57_s12 = int_to_ptr.vmem [resolvable:$true] %s56_s12  ;;  %s1746_s30 = int_to_ptr.vmem [resolvable:$true] %s82_s30 }
  0x1c   :  { %s2144_s1 = sld [smem:[#allocation38_spill]] }
  0x22   :  { %s1277_s22 = scalar_lea.hbm %s2144_s1, 256 }
  0x23   :  { %p1278_p3 = scmp.ne.s32.totalorder %s2144_s1, %s1277_s22  ;;  %p1281_p4 = scmp.lt.u32.totalorder %s1277_s22, %s2144_s1 }
  0x25   :  { %p1283_p5 = pnand %p1281_p4, %p1278_p3 }
  0x27   :  { %1286 = shalt.err (!%p1283_p5)
}
  0x28   :  { %s1287_s3 = scalar_lea.vmem %s57_s12, 256  ;;  %p1292_p7 = scmp.lt.s32.totalorder %s57_s12, %s57_s12 }
  0x29   :  { %p1288_p6 = scmp.ne.s32.totalorder %s57_s12, %s1287_s3  ;;  %p1293_p8 = scmp.lt.s32.totalorder %s1287_s3, %s1287_s3 }
  0x2b   :  { %p1294_p9 = por %p1293_p8, %p1292_p7 }
  0x2d   :  { %p1295_p10 = pnand %p1294_p9, %p1288_p6 }
  0x2f   :  { %1298 = shalt.err (!%p1295_p10)
}
  0x30   :  { %s2135_s26 = smov 128   ;;  %s1607_s27 = smov 8  }
  0x31   :  { %62 = dma.hbm_to_vmem [thread:$0]  %s2144_s1, 256, %s57_s12, [#allocation8], %s2135_s26, %s2135_s26, %s1607_s27  }
  0x32   :  { %s1299_s21 = scalar_lea.hbm %s2114_s6, 256 }
  0x33   :  { %p1300_p11 = scmp.ne.s32.totalorder %s2114_s6, %s1299_s21  ;;  %p1303_p12 = scmp.lt.u32.totalorder %s1299_s21, %s2114_s6 }
  0x35   :  { %p1305_p13 = pnand %p1303_p12, %p1300_p11 }
  0x37   :  { %1308 = shalt.err (!%p1305_p13)
}
  0x38   :  { %s1309_s25 = scalar_lea.vmem %s1746_s30, 256  ;;  %p1314_p1 = scmp.lt.s32.totalorder %s1746_s30, %s1746_s30 }
  0x39   :  { %p1310_p0 = scmp.ne.s32.totalorder %s1746_s30, %s1309_s25  ;;  %p1315_p2 = scmp.lt.s32.totalorder %s1309_s25, %s1309_s25 }
  0x3b   :  { %p1316_p3 = por %p1315_p2, %p1314_p1 }
  0x3d   :  { %p1317_p4 = pnand %p1316_p3, %p1310_p0 }
  0x3f   :  { %1320 = shalt.err (!%p1317_p4)
}
  0x40   :  { %88 = dma.hbm_to_vmem [thread:$0]  %s2114_s6, 256, %s1746_s30, [#allocation11], %s2135_s26, %s2135_s26, %s1607_s27  }
  0x41   :  { %s1608_s3 = smov [#allocation13]   ;;  %s1321_s0 = scalar_lea.hbm %s2116_s8, 256 }
  0x42   :  { %s106_s28 = sshll.u32 %s1608_s3, 4  ;;  %p1322_p5 = scmp.ne.s32.totalorder %s2116_s8, %s1321_s0  ;;  %s107_s28 = int_to_ptr.vmem [resolvable:$true] %s106_s28 }
  0x43   :  { %p1325_p6 = scmp.lt.u32.totalorder %s1321_s0, %s2116_s8 }
  0x45   :  { %p1327_p7 = pnand %p1325_p6, %p1322_p5 }
  0x47   :  { %1330 = shalt.err (!%p1327_p7)
}
  0x48   :  { %s1331_s2 = scalar_lea.vmem %s107_s28, 256  ;;  %p1336_p9 = scmp.lt.s32.totalorder %s107_s28, %s107_s28 }
  0x49   :  { %p1332_p8 = scmp.ne.s32.totalorder %s107_s28, %s1331_s2  ;;  %p1337_p10 = scmp.lt.s32.totalorder %s1331_s2, %s1331_s2 }
  0x4b   :  { %p1338_p11 = por %p1337_p10, %p1336_p9 }
  0x4d   :  { %p1339_p12 = pnand %p1338_p11, %p1332_p8 }
  0x4f   :  { %1342 = shalt.err (!%p1339_p12)
}
  0x50   :  { %s1609_s6 = smov 64   ;;  %s1610_s30 = smov 4  }
  0x51   :  { %112 = dma.hbm_to_vmem [thread:$0]  %s2116_s8, 256, %s107_s28, [#allocation14], %s1609_s6, %s1609_s6, %s1610_s30  }
  0x52   :  { %s1611_s1 = smov [#allocation16]   ;;  %s1612_s4 = smov [#allocation19]  }
  0x53   :  { %s131_s3 = sshll.u32 %s1611_s1, 4  ;;  %s153_s29 = sshll.u32 %s1612_s4, 4  ;;  %s132_s3 = int_to_ptr.vmem [resolvable:$true] %s131_s3  ;;  %s154_s29 = int_to_ptr.vmem [resolvable:$true] %s153_s29 }
  0x54   :  { %s1343_s22 = scalar_lea.hbm %s2118_s10, 16 }
  0x55   :  { %p1344_p13 = scmp.ne.s32.totalorder %s2118_s10, %s1343_s22  ;;  %p1347_p0 = scmp.lt.u32.totalorder %s1343_s22, %s2118_s10 }
  0x57   :  { %p1349_p1 = pnand %p1347_p0, %p1344_p13 }
  0x59   :  { %1352 = shalt.err (!%p1349_p1)
}
  0x5a   :  { %s1353_s8 = scalar_lea.vmem %s132_s3, 16  ;;  %s1357_s28 = scalar_lea.vmem %s132_s3, 32 }
  0x5b   :  { %p1354_p2 = scmp.ne.s32.totalorder %s132_s3, %s1353_s8  ;;  %p1358_p3 = scmp.lt.s32.totalorder %s132_s3, %s132_s3 }
  0x5c   :  { %p1359_p4 = scmp.lt.s32.totalorder %s1357_s28, %s1353_s8 }
  0x5e   :  { %p1360_p5 = por %p1359_p4, %p1358_p3 }
  0x60   :  { %p1361_p6 = pnand %p1360_p5, %p1354_p2 }
  0x62   :  { %1364 = shalt.err (!%p1361_p6)
}
  0x63   :  { %134 = dma.hbm_to_vmem [thread:$0]  %s2118_s10, 16, %s132_s3, [#allocation17]  }
  0x64   :  { %s1365_s26 = scalar_lea.hbm %s2121_s13, 32 }
  0x65   :  { %p1366_p7 = scmp.ne.s32.totalorder %s2121_s13, %s1365_s26  ;;  %p1369_p8 = scmp.lt.u32.totalorder %s1365_s26, %s2121_s13 }
  0x67   :  { %p1371_p9 = pnand %p1369_p8, %p1366_p7 }
  0x69   :  { %1374 = shalt.err (!%p1371_p9)
}
  0x6a   :  { %s1375_s24 = scalar_lea.vmem %s154_s29, 32  ;;  %p1380_p11 = scmp.lt.s32.totalorder %s154_s29, %s154_s29 }
  0x6b   :  { %p1376_p10 = scmp.ne.s32.totalorder %s154_s29, %s1375_s24  ;;  %p1381_p12 = scmp.lt.s32.totalorder %s1375_s24, %s1375_s24 }
  0x6d   :  { %p1382_p13 = por %p1381_p12, %p1380_p11 }
  0x6f   :  { %p1383_p0 = pnand %p1382_p13, %p1376_p10 }
  0x71   :  { %1386 = shalt.err (!%p1383_p0)
}
  0x72   :  { %156 = dma.hbm_to_vmem [thread:$0]  %s2121_s13, 32, %s154_s29, [#allocation20]  }
  0x73   :  { %s1613_s2 = smov [#allocation22]   ;;  %s1614_s28 = smov [#allocation4]  }
  0x74   :  { %s175_s8 = sshll.u32 %s1613_s2, 4  ;;  %s44_s25 = sshll.u32 %s1614_s28, 4  ;;  %s176_s8 = int_to_ptr.vmem [resolvable:$true] %s175_s8  ;;  %s45_s25 = int_to_ptr.vmem [resolvable:$true] %s44_s25 }
  0x75   :  { %s1387_s4 = scalar_lea.hbm %s2123_s15, 16 }
  0x76   :  { %p1388_p1 = scmp.ne.s32.totalorder %s2123_s15, %s1387_s4  ;;  %p1391_p2 = scmp.lt.u32.totalorder %s1387_s4, %s2123_s15 }
  0x78   :  { %p1393_p3 = pnand %p1391_p2, %p1388_p1 }
  0x7a   :  { %1396 = shalt.err (!%p1393_p3)
}
  0x7b   :  { %s1397_s13 = scalar_lea.vmem %s176_s8, 16  ;;  %s1401_s29 = scalar_lea.vmem %s176_s8, 32 }
  0x7c   :  { %p1398_p4 = scmp.ne.s32.totalorder %s176_s8, %s1397_s13  ;;  %p1402_p5 = scmp.lt.s32.totalorder %s176_s8, %s176_s8 }
  0x7d   :  { %p1403_p6 = scmp.lt.s32.totalorder %s1401_s29, %s1397_s13 }
  0x7f   :  { %p1404_p7 = por %p1403_p6, %p1402_p5 }
  0x81   :  { %p1405_p8 = pnand %p1404_p7, %p1398_p4 }
  0x83   :  { %1408 = shalt.err (!%p1405_p8)
}
  0x84   :  { %178 = dma.hbm_to_vmem [thread:$0]  %s2123_s15, 16, %s176_s8, [#allocation23]  }
  0x85   :  { %s2145_s2 = sld [smem:[#allocation37_spill]] }
  0x8b   :  { %s1409_s28 = scalar_lea.hbm %s2145_s2, 256 }
  0x8c   :  { %p1410_p9 = scmp.ne.s32.totalorder %s2145_s2, %s1409_s28  ;;  %p1413_p10 = scmp.lt.u32.totalorder %s1409_s28, %s2145_s2 }
  0x8e   :  { %p1415_p11 = pnand %p1413_p10, %p1410_p9 }
  0x90   :  { %1418 = shalt.err (!%p1415_p11)
}
  0x91   :  { %s1419_s0 = scalar_lea.vmem %s45_s25, 256  ;;  %p1424_p13 = scmp.lt.s32.totalorder %s45_s25, %s45_s25 }
  0x92   :  { %p1420_p12 = scmp.ne.s32.totalorder %s45_s25, %s1419_s0  ;;  %p1425_p0 = scmp.lt.s32.totalorder %s1419_s0, %s1419_s0 }
  0x94   :  { %p1426_p1 = por %p1425_p0, %p1424_p13 }
  0x96   :  { %p1427_p2 = pnand %p1426_p1, %p1420_p12 }
  0x98   :  { %1430 = shalt.err (!%p1427_p2)
}
  0x99   :  { %s2146_s15 = smov 128   ;;  %s1615_s22 = smov [#allocation9]  }
  0x9a   :  { %50 = dma.hbm_to_vmem [thread:$0]  %s2145_s2, 256, %s45_s25, [#allocation5], %s2146_s15, %s2146_s15, %s1607_s27  }
  0x9b   :  { %s70_s13 = sshll.u32 %s1615_s22, 4  ;;  %s1431_s24 = scalar_lea.hbm %s2113_s5, 512  ;;  %s71_s13 = int_to_ptr.vmem [resolvable:$true] %s70_s13 }
  0x9c   :  { %p1432_p3 = scmp.ne.s32.totalorder %s2113_s5, %s1431_s24  ;;  %p1435_p4 = scmp.lt.u32.totalorder %s1431_s24, %s2113_s5 }
  0x9e   :  { %p1437_p5 = pnand %p1435_p4, %p1432_p3 }
  0xa0   :  { %1440 = shalt.err (!%p1437_p5)
}
  0xa1   :  { %s1441_s1 = scalar_lea.vmem %s71_s13, 512  ;;  %p1446_p7 = scmp.lt.s32.totalorder %s71_s13, %s71_s13 }
  0xa2   :  { %p1442_p6 = scmp.ne.s32.totalorder %s71_s13, %s1441_s1  ;;  %p1447_p8 = scmp.lt.s32.totalorder %s1441_s1, %s1441_s1 }
  0xa4   :  { %p1448_p9 = por %p1447_p8, %p1446_p7 }
  0xa6   :  { %p1449_p10 = pnand %p1448_p9, %p1442_p6 }
  0xa8   :  { %1452 = shalt.err (!%p1449_p10)
}
  0xa9   :  { %s1616_s25 = smov 256   ;;  %s1617_s2 = smov 16  }
  0xaa   :  { %76 = dma.hbm_to_vmem [thread:$0]  %s2113_s5, 512, %s71_s13, [#allocation8], %s1616_s25, %s1616_s25, %s1617_s2  }
  0xab   :  { %s1618_s0 = smov [#allocation12]   ;;  %s1619_s21 = smov [#allocation15]  }
  0xac   :  { %s94_s8 = sshll.u32 %s1618_s0, 4  ;;  %s118_s22 = sshll.u32 %s1619_s21, 4  ;;  %s95_s8 = int_to_ptr.vmem [resolvable:$true] %s94_s8  ;;  %s1861_s22 = int_to_ptr.vmem [resolvable:$true] %s118_s22 }
  0xad   :  { %s1453_s24 = scalar_lea.hbm %s2115_s7, 256 }
  0xae   :  { %p1454_p11 = scmp.ne.s32.totalorder %s2115_s7, %s1453_s24  ;;  %p1457_p12 = scmp.lt.u32.totalorder %s1453_s24, %s2115_s7 }
  0xb0   :  { %p1459_p13 = pnand %p1457_p12, %p1454_p11 }
  0xb2   :  { %1462 = shalt.err (!%p1459_p13)
}
  0xb3   :  { %s1463_s5 = scalar_lea.vmem %s95_s8, 256  ;;  %p1468_p1 = scmp.lt.s32.totalorder %s95_s8, %s95_s8 }
  0xb4   :  { %p1464_p0 = scmp.ne.s32.totalorder %s95_s8, %s1463_s5  ;;  %p1469_p2 = scmp.lt.s32.totalorder %s1463_s5, %s1463_s5 }
  0xb6   :  { %p1470_p3 = por %p1469_p2, %p1468_p1 }
  0xb8   :  { %p1471_p4 = pnand %p1470_p3, %p1464_p0 }
  0xba   :  { %1474 = shalt.err (!%p1471_p4)
}
  0xbb   :  { %100 = dma.hbm_to_vmem [thread:$0]  %s2115_s7, 256, %s95_s8, [#allocation11], %s2146_s15, %s2146_s15, %s1607_s27  }
  0xbc   :  { %s1475_s4 = scalar_lea.hbm %s2117_s9, 256 }
  0xbd   :  { %p1476_p5 = scmp.ne.s32.totalorder %s2117_s9, %s1475_s4  ;;  %p1479_p6 = scmp.lt.u32.totalorder %s1475_s4, %s2117_s9 }
  0xbf   :  { %p1481_p7 = pnand %p1479_p6, %p1476_p5 }
  0xc1   :  { %1484 = shalt.err (!%p1481_p7)
}
  0xc2   :  { %s1485_s23 = scalar_lea.vmem %s1861_s22, 256  ;;  %p1490_p9 = scmp.lt.s32.totalorder %s1861_s22, %s1861_s22 }
  0xc3   :  { %p1486_p8 = scmp.ne.s32.totalorder %s1861_s22, %s1485_s23  ;;  %p1491_p10 = scmp.lt.s32.totalorder %s1485_s23, %s1485_s23 }
  0xc5   :  { %p1492_p11 = por %p1491_p10, %p1490_p9 }
  0xc7   :  { %p1493_p12 = pnand %p1492_p11, %p1486_p8 }
  0xc9   :  { %1496 = shalt.err (!%p1493_p12)
}
  0xca   :  { %124 = dma.hbm_to_vmem [thread:$0]  %s2117_s9, 256, %s1861_s22, [#allocation14], %s1609_s6, %s1609_s6, %s1610_s30  }
  0xcb   :  { %s1620_s15 = smov [#allocation18]   ;;  %s1621_s24 = smov [#allocation21]  }
  0xcc   :  { %s141_s8 = sshll.u32 %s1620_s15, 4  ;;  %s162_s10 = sshll.u32 %s1621_s24, 4  ;;  %s142_s8 = int_to_ptr.vmem [resolvable:$true] %s141_s8  ;;  %s1898_s10 = int_to_ptr.vmem [resolvable:$true] %s162_s10 }
  0xcd   :  { %s1497_s12 = scalar_lea.hbm %s2119_s11, 16 }
  0xce   :  { %p1498_p13 = scmp.ne.s32.totalorder %s2119_s11, %s1497_s12  ;;  %p1501_p0 = scmp.lt.u32.totalorder %s1497_s12, %s2119_s11 }
  0xd0   :  { %p1503_p1 = pnand %p1501_p0, %p1498_p13 }
  0xd2   :  { %1506 = shalt.err (!%p1503_p1)
}
  0xd3   :  { %s1507_s9 = scalar_lea.vmem %s142_s8, 16  ;;  %s1511_s22 = scalar_lea.vmem %s142_s8, 32 }
  0xd4   :  { %p1508_p2 = scmp.ne.s32.totalorder %s142_s8, %s1507_s9  ;;  %p1512_p3 = scmp.lt.s32.totalorder %s142_s8, %s142_s8 }
  0xd5   :  { %p1513_p4 = scmp.lt.s32.totalorder %s1511_s22, %s1507_s9 }
  0xd7   :  { %p1514_p5 = por %p1513_p4, %p1512_p3 }
  0xd9   :  { %p1515_p6 = pnand %p1514_p5, %p1508_p2 }
  0xdb   :  { %1518 = shalt.err (!%p1515_p6)
}
  0xdc   :  { %144 = dma.hbm_to_vmem [thread:$0]  %s2119_s11, 16, %s142_s8, [#allocation17]  }
  0xdd   :  { %s1519_s21 = scalar_lea.hbm %s2122_s14, 256 }
  0xde   :  { %p1520_p7 = scmp.ne.s32.totalorder %s2122_s14, %s1519_s21  ;;  %p1523_p8 = scmp.lt.u32.totalorder %s1519_s21, %s2122_s14 }
  0xe0   :  { %p1525_p9 = pnand %p1523_p8, %p1520_p7 }
  0xe2   :  { %1528 = shalt.err (!%p1525_p9)
}
  0xe3   :  { %s1529_s15 = scalar_lea.vmem %s1898_s10, 256  ;;  %p1534_p11 = scmp.lt.s32.totalorder %s1898_s10, %s1898_s10 }
  0xe4   :  { %p1530_p10 = scmp.ne.s32.totalorder %s1898_s10, %s1529_s15  ;;  %p1535_p12 = scmp.lt.s32.totalorder %s1529_s15, %s1529_s15 }
  0xe6   :  { %p1536_p13 = por %p1535_p12, %p1534_p11 }
  0xe8   :  { %p1537_p0 = pnand %p1536_p13, %p1530_p10 }
  0xea   :  { %1540 = shalt.err (!%p1537_p0)
}
  0xeb   :  { %168 = dma.hbm_to_vmem [thread:$0]  %s2122_s14, 256, %s1898_s10, [#allocation20], %s1609_s6, %s1609_s6, %s1610_s30  }
  0xec   :  { %s1622_s24 = smov [#allocation24]   ;;  %s1541_s5 = scalar_lea.hbm %s2125_s17, 256 }
  0xed   :  { %s186_s3 = sshll.u32 %s1622_s24, 4  ;;  %p1542_p1 = scmp.ne.s32.totalorder %s2125_s17, %s1541_s5  ;;  %s187_s3 = int_to_ptr.vmem [resolvable:$true] %s186_s3 }
  0xee   :  { %p1545_p2 = scmp.lt.u32.totalorder %s1541_s5, %s2125_s17 }
  0xf0   :  { %p1547_p3 = pnand %p1545_p2, %p1542_p1 }
  0xf2   :  { %1550 = shalt.err (!%p1547_p3)
}
  0xf3   :  { %s1551_s22 = scalar_lea.vmem %s187_s3, 256  ;;  %p1556_p5 = scmp.lt.s32.totalorder %s187_s3, %s187_s3 }
  0xf4   :  { %p1552_p4 = scmp.ne.s32.totalorder %s187_s3, %s1551_s22  ;;  %p1557_p6 = scmp.lt.s32.totalorder %s1551_s22, %s1551_s22 }
  0xf6   :  { %p1558_p7 = por %p1557_p6, %p1556_p5 }
  0xf8   :  { %p1559_p8 = pnand %p1558_p7, %p1552_p4 }
  0xfa   :  { %1562 = shalt.err (!%p1559_p8)
}
  0xfb   :  { %192 = dma.hbm_to_vmem [thread:$0]  %s2125_s17, 256, %s187_s3, [#allocation23], %s1609_s6, %s1609_s6, %s1610_s30  }
  0xfc   :  { %1587 = dma.done.wait [#allocation5], 256  }
  0xfd   :  { %1588 = vsyncadd [#allocation5], 4294967040 }
  0xfe   :  { %1589 = dma.done.wait [#allocation8], 768  }
  0xff   :  { %1590 = vsyncadd [#allocation8], 4294966528 }
 0x100   :  { %1591 = dma.done.wait [#allocation11], 512  }
 0x101   :  { %1592 = vsyncadd [#allocation11], 4294966784 }
 0x102   :  { %1593 = dma.done.wait [#allocation14], 512  }
 0x103   :  { %1594 = vsyncadd [#allocation14], 4294966784 }
 0x104   :  { %1595 = dma.done.wait [#allocation17], 32  }
 0x105   :  { %1596 = vsyncadd [#allocation17], 4294967264 }
 0x106   :  { %1597 = dma.done.wait [#allocation20], 288  }
 0x107   :  { %1598 = vsyncadd [#allocation20], 4294967008 }
 0x108   :  { %1599 = dma.done.wait [#allocation23], 272  }
 0x109   :  { %1600 = vsyncadd [#allocation23], 4294967024  ;;  %v1623_v0 = vmov 0   ;;  %v1624_v1 = vmov 0.0   ;;  %vm1625_vm0 = vmmov 0   ;;  %s2147_s2 = sld [smem:[#allocation36_spill]]  ;;  %v264_v13 = vlaneseq }
 0x10a   :  { %1196 = vset.pattern.permute.xlu1 %v1623_v0  ;;  %1195 = vset.pattern.permute.xlu0 %v1623_v0  ;;  %v1227_v6 = vld [vmem:[#allocation15] sm:$0xff]   ;;  %v1228_v7 = vld [vmem:[#allocation15 + $0x8] sm:$0xff]   ;;  %v1959_v8 = vld [vmem:[#allocation4] sm:$0xff]  ;;  %vm317_vm1 = vcmask 261120   ;;  %s1083_s0 = sld [smem:[#allocation3 + $0x1]]  ;;  %s244_s21 = sld [smem:[#allocation3]] }
 0x10b   :  { %1137 = vmatprep.subr.bf16.mxu1 %v1624_v1  ;;  %1141 = vmatprep.mubr.msk.bf16.mxu1 %vm1625_vm0, %v1624_v1  ;;  %v1961_v9 = vld [vmem:[#allocation4 + $0x8] sm:$0xff]  ;;  %v1229_v10 = vld [vmem:[#allocation13] sm:$0xff]   ;;  %v1971_v16 = vshrl.u32 %v264_v13, 7  ;;  %s1626_s15 = smov 96   ;;  %s1627_s11 = smov 32   ;;  %vm667_vm2 = vcmask 1040384  }
 0x10c   :  { %1129 = vmatprep.subr.bf16.mxu0 %v1624_v1  ;;  %1133 = vmatprep.mubr.msk.bf16.mxu0 %vm1625_vm0, %v1624_v1  ;;  %v362_v11 = vpack.c.bf16 %v1961_v9, %v1959_v8  ;;  %v1230_v12 = vld [vmem:[#allocation13 + $0x8] sm:$0xff]   ;;  %v1088_v33 = vld [vmem:[#allocation18] ss:$0 sm:$0xff]  ;;  %v1084_v40 = vld [vmem:[#allocation16] ss:$0 sm:$0xff]  ;;  %s2148_s3 = sld [smem:[#allocation40_spill]] }
 0x10d   :  { %1138 = vmatpush3.bf16.msra.mxu1 %v1227_v6  ;;  %1130 = vmatpush3.bf16.msra.mxu0 %v1229_v10  ;;  %v1974_v21 = vsub.s32 0, %v1971_v16  ;;  %vm669_vm3 = vcmask 1041408   ;;  %vm671_vm4 = vcmask 1042432   ;;  %vm673_vm5 = vcmask 1043456   ;;  %s2149_s4 = sld [smem:[#allocation39_spill]] }
 0x10e   :  { %1139 = vmatprep.subr.bf16.mxu1 %v1624_v1  ;;  %1131 = vmatprep.subr.bf16.mxu0 %v1624_v1  ;;  %vm675_vm6 = vcmask 1044480   ;;  %vm677_vm7 = vcmask 1045504   ;;  %vm679_vm8 = vcmask 1046528   ;;  %vm1000_vm9 = vcmask 785408  }
 0x10f   :  { %v270_v2 = vld [vmem:[%s2147_s2 + $0x1] sm:$0x1]  ;;  %v245_v3 = vld [vmem:[%s2147_s2] sm:$0x1]  ;;  %vm998_vm10 = vcmask 523264  }
 0x110   :  { %275 = vperm.xlu1 %1196, %v270_v2   ;;  %v279_v4 = vsub.f32 1.0, %v270_v2  ;;  %250 = vperm.xlu0 %1195, %v245_v3   ;;  %v254_v5 = vsub.f32 1.0, %v245_v3  ;;  %s271_s29 = scalar_lea.vmem [#allocation10], %s1083_s0  ;;  %s246_s23 = scalar_lea.vmem [#allocation10], %s244_s21 }
 0x111   :  { %1140 = vmatpush3.bf16.msra.mxu1 %v1228_v7  ;;  %1132 = vmatpush3.bf16.msra.mxu0 %v1230_v12  ;;  %v272_v17 = vld [vmem:[%s271_s29] sm:$0x1]  ;;  %s280_s7 = scalar_lea.vmem [#allocation12], %s1083_s0  ;;  %s255_s27 = scalar_lea.vmem [#allocation12], %s244_s21 }
 0x112   :  { %1145 = vmatprep.subr.bf16.mxu1 %v1624_v1  ;;  %v247_v18 = vld [vmem:[%s246_s23] sm:$0x1]  ;;  %v1236_v7 = vld [vmem:[%s2148_s3 + $0x14] ss:$8 sps:$4 sm:$0xff]   ;;  %v1234_v10 = vld [vmem:[%s2148_s3 + $0x10] ss:$8 sps:$4 sm:$0xff]  }
 0x113   :  { %v281_v19 = vld [vmem:[%s280_s7] sm:$0x1] }
 0x114   :  { %284 = vperm.xlu1 %1196, %v279_v4   ;;  %259 = vperm.xlu0 %1195, %v254_v5   ;;  %v256_v20 = vld [vmem:[%s255_s27] sm:$0x1]  ;;  %v1233_v4 = vld [vmem:[%s2148_s3 + $0x4] ss:$8 sps:$4 sm:$0xff]  }
 0x115   :  { %1142 = vmatmul.mubr.msk.bf16.vlgmr.msra.gmra.mrb[0].mxu1 %vm317_vm1, %v362_v11  ;;  %v1231_v5 = vld [vmem:[%s2148_s3] ss:$8 sps:$4 sm:$0xff]   ;;  %548 = vmatprep.subr.bf16.mxu0 %v1233_v4 }
 0x116   :  { %1149 = vmatprep.mubr.msk.bf16.mxu1 %vm1625_vm0, %v1624_v1 }
 0x18f   :  { %v276_v14 = vpop.permute.xlu1 %275  ;;  %v251_v15 = vpop.permute.xlu0 %250 }
 0x190   :  { %v278_v24 = vmul.f32 %v276_v14, %v272_v17  ;;  %v253_v25 = vmul.f32 %v251_v15, %v247_v18 }
 0x193   :  { %v285_v22 = vpop.permute.xlu1 %284  ;;  %v260_v23 = vpop.permute.xlu0 %259 }
 0x194   :  { %v287_v26 = vmul.f32 %v285_v22, %v281_v19  ;;  %v262_v27 = vmul.f32 %v260_v23, %v256_v20 }
 0x196   :  { %v288_v28 = vadd.f32 %v287_v26, %v278_v24  ;;  %v263_v29 = vadd.f32 %v262_v27, %v253_v25  ;;  %v239_v24 = vld [vmem:[#allocation7] sm:$0xff]  ;;  %v240_v25 = vld [vmem:[#allocation7 + $0x8] sm:$0xff] }
 0x197   :  { %v490_v26 = vsub.f32 1.0, %v239_v24  ;;  %v491_v27 = vsub.f32 1.0, %v240_v25 }
 0x198   :  { %v292_v30 = vrot.slane %v288_v28, %v1974_v21  ;;  %v267_v31 = vrot.slane %v263_v29, %v1974_v21 }
 0x199   :  { %v492_v28 = vmul.f32 %v490_v26, %v1959_v8 }
 0x19a   :  { %v293_v32 = vpack.c.bf16 %v292_v30, %v267_v31  ;;  %v493_v31 = vmul.f32 %v491_v27, %v1961_v9 }
 0x19c   :  { %1134 = vmatmul.mubr.msk.bf16.vlgmr.msra.gmra.mrb[0].mxu0 %vm317_vm1, %v293_v32 }
 0x19d   :  { %580 = vmatprep.mubr.bf16.mxu0 %v1623_v0  ;;  %549 = vmatpush1.bf16.msra.mxu0 %v1231_v5 }
 0x19e   :  { %550 = vmatprep.subr.bf16.mxu0 %v1236_v7 }
 0x1a1   :  { %551 = vmatpush1.bf16.msra.mxu0 %v1234_v10 }
 0x1a2   :  { %1153 = vmatprep.subr.bf16.mxu0 %v1624_v1 }
 0x1e8   :  { %v423_v34 = vpop.f32.mrb[0].mxu1 }
 0x1e9   :  { %v424_v35 = vadd.f32 %v1088_v33, %v423_v34  ;;  %v1143_v36 = vpop.f32.mrb[1].mxu1 }
 0x1ea   :  { %v426_v37 = vpop.f32.mrb[2].mxu1 }
 0x1eb   :  { %v427_v38 = vadd.f32 %v1088_v33, %v426_v37  ;;  %v1144_v39 = vpop.f32.mrb[3].mxu1  ;;  %446 = vrot.lane.b32.xlu0 %v424_v35, %s1609_s6 }
 0x1ec   :  { %v513_v39 = vld [vmem:[#allocation19] sm:$0x3] }
 0x1ed   :  { %448 = vrot.lane.b32.xlu1 %v427_v38, %s1609_s6 }
 0x25d   :  { %v447_v55 = vpop.permute.xlu0 %446 }
 0x25f   :  { %v449_v59 = vpop.permute.xlu1 %448 }
 0x26f   :  { %v355_v41 = vpop.f32.mrb[0].mxu0 }
 0x270   :  { %v356_v42 = vadd.f32 %v1084_v40, %v355_v41  ;;  %v1135_v43 = vpop.f32.mrb[1].mxu0  ;;  %v518_v41 = vrot.slane %v513_v39, %v1974_v21 }
 0x271   :  { %v358_v44 = vpop.f32.mrb[2].mxu0 }
 0x272   :  { %v430_v45 = vadd.f32 %v424_v35, %v356_v42  ;;  %v359_v46 = vadd.f32 %v1084_v40, %v358_v44  ;;  %v1136_v47 = vpop.f32.mrb[3].mxu0  ;;  %v521_v40 = vsub.s32 1, %v1971_v16 }
 0x274   :  { %v1092_v48 = vmul.f32 -1.442695, %v430_v45  ;;  %v431_v49 = vadd.f32 %v427_v38, %v359_v46 }
 0x276   :  { %1243 = vpow2.f32 %v1092_v48  ;;  %v1093_v50 = vmul.f32 -1.442695, %v431_v49 }
 0x278   :  { %1245 = vpow2.f32 %v1093_v50 }
 0x280   :  { %v1244_v51 = vpop.eup %1243 }
 0x281   :  { %v438_v52 = vadd.f32 1.0, %v1244_v51 }
 0x282   :  { %v1246_v53 = vpop.eup %1245 }
 0x283   :  { %1247 = vrcp.f32 %v438_v52  ;;  %v439_v54 = vadd.f32 1.0, %v1246_v53  ;;  %v597_v52 = vld [vmem:[#allocation9 + $0x10] sm:$0xff] }
 0x285   :  { %1249 = vrcp.f32 %v439_v54 }
 0x28d   :  { %v1248_v56 = vpop.eup %1247 }
 0x28e   :  { %v452_v57 = vmul.f32 %v1248_v56, %v447_v55  ;;  %v466_v12 = vsub.f32 1.0, %v1248_v56 }
 0x28f   :  { %v1250_v58 = vpop.eup %1249 }
 0x290   :  { %v453_v60 = vmul.f32 %v1250_v58, %v449_v59  ;;  %456 = vrot.lane.b32.xlu0 %v452_v57, %s1609_s6  ;;  %v467_v15 = vsub.f32 1.0, %v1250_v58 }
 0x292   :  { %458 = vrot.lane.b32.xlu1 %v453_v60, %s1609_s6 }
 0x302   :  { %v457_v61 = vpop.permute.xlu0 %456 }
 0x303   :  { %v462_v62 = vadd.f32 %v457_v61, %v356_v42  ;;  %v522_v42 = vrot.slane %v513_v39, %v521_v40 }
 0x304   :  { %v459_v63 = vpop.permute.xlu1 %458 }
 0x305   :  { %1251 = vtanh.f32 %v462_v62  ;;  %v463_v0 = vadd.f32 %v459_v63, %v359_v46  ;;  %v595_v46 = vld [vmem:[#allocation9] sm:$0xff] }
 0x307   :  { %1253 = vtanh.f32 %v463_v0 }
 0x30f   :  { %v1252_v2 = vpop.eup %1251 }
 0x310   :  { %470 = vrot.lane.b32.xlu0 %v1252_v2, %s1626_s15 }
 0x311   :  { %v1254_v3 = vpop.eup %1253 }
 0x312   :  { %472 = vrot.lane.b32.xlu1 %v1254_v3, %s1626_s15 }
 0x314   :  { %480 = vrot.lane.b32.xlu0 %v1959_v8, %s1627_s11 }
 0x316   :  { %482 = vrot.lane.b32.xlu1 %v1961_v9, %s1627_s11 }
 0x382   :  { %v471_v6 = vpop.permute.xlu0 %470 }
 0x383   :  { %v476_v14 = vmul.f32 %v471_v6, %v466_v12 }
 0x384   :  { %v473_v11 = vpop.permute.xlu1 %472 }
 0x385   :  { %v477_v19 = vmul.f32 %v473_v11, %v467_v15 }
 0x386   :  { %v481_v13 = vpop.permute.xlu0 %480 }
 0x387   :  { %v486_v17 = vmul.f32 %v1248_v56, %v481_v13  ;;  %v598_v56 = vld [vmem:[#allocation9 + $0x18] sm:$0xff] }
 0x388   :  { %v483_v18 = vpop.permute.xlu1 %482 }
 0x389   :  { %v488_v20 = vadd.f32 %v486_v17, %v476_v14  ;;  %v487_v22 = vmul.f32 %v1250_v58, %v483_v18  ;;  %v1237_v14 = vld [vmem:[#allocation21] sm:$0xff]  }
 0x38a   :  { %1146 = vmatpush3.bf16.msra.mxu1 %v1237_v14 }
 0x38b   :  { %v489_v23 = vadd.f32 %v487_v22, %v477_v19  ;;  %496 = vrot.lane.b32.xlu0 %v488_v20, %s1626_s15  ;;  %1147 = vmatprep.subr.bf16.mxu1 %v1624_v1 }
 0x38d   :  { %498 = vrot.lane.b32.xlu1 %v489_v23, %s1626_s15  ;;  %v1238_v23 = vld [vmem:[#allocation21 + $0x8] sm:$0xff]  }
 0x38e   :  { %1148 = vmatpush3.bf16.msra.mxu1 %v1238_v23 }
 0x38f   :  { %1161 = vmatprep.subr.bf16.mxu1 %v1624_v1 }
 0x3fd   :  { %v497_v29 = vpop.permute.xlu0 %496 }
 0x3fe   :  { %v502_v30 = vmul.f32 %v497_v29, %v239_v24 }
 0x3ff   :  { %v499_v32 = vpop.permute.xlu1 %498 }
 0x400   :  { %v2006_v33 = vadd.f32 %v502_v30, %v492_v28  ;;  %v503_v34 = vmul.f32 %v499_v32, %v240_v25 }
 0x402   :  { %v2008_v35 = vadd.f32 %v503_v34, %v493_v31  ;;  %v506_v36 = vsub.f32 %v2006_v33, %v1959_v8 }
 0x404   :  { %v507_v37 = vsub.f32 %v2008_v35, %v1961_v9  ;;  %v596_v9 = vld [vmem:[#allocation9 + $0x8] sm:$0xff] }
 0x406   :  { %v508_v38 = vpack.c.bf16 %v507_v37, %v506_v36 }
 0x408   :  { %1098 = vmatmul.mubr.msk.bf16.vlgmr.msra.gmra.mrb[4].mxu0 %vm317_vm1, %v508_v38 }
 0x409   :  { %1157 = vmatprep.mubr.msk.bf16.mxu0 %vm1625_vm0, %v1624_v1 }
 0x4db   :  { %v582_v43 = vpop.f32.mrb[4].mxu0 }
 0x4dc   :  { %v583_v44 = vadd.f32 %v582_v43, %v518_v41  ;;  %v584_v45 = vpop.f32.mrb[5].mxu0 }
 0x4dd   :  { %v585_v8 = vadd.f32 %v584_v45, %v522_v42  ;;  %v586_v47 = vpop.f32.mrb[6].mxu0 }
 0x4de   :  { %v591_v48 = vmax.f32 %v583_v44, 0.0  ;;  %v587_v49 = vadd.f32 %v586_v47, %v518_v41  ;;  %v588_v50 = vpop.f32.mrb[7].mxu0 }
 0x4df   :  { %v592_v51 = vmax.f32 %v585_v8, 0.0  ;;  %v589_v53 = vadd.f32 %v588_v50, %v522_v42 }
 0x4e0   :  { %v599_v54 = vmul.f32 %v595_v46, %v591_v48  ;;  %v593_v55 = vmax.f32 %v587_v49, 0.0 }
 0x4e1   :  { %v600_v16 = vmul.f32 %v596_v9, %v592_v51  ;;  %v594_v57 = vmax.f32 %v589_v53, 0.0 }
 0x4e2   :  { %v603_v21 = vrot.slane %v599_v54, 4  ;;  %v601_v58 = vmul.f32 %v597_v52, %v593_v55 }
 0x4e3   :  { %v609_v59 = vrot.slane %v600_v16, 4  ;;  %v602_v60 = vmul.f32 %v598_v56, %v594_v57 }
 0x4e4   :  { %v604_v61 = vadd.f32 %v603_v21, %v599_v54  ;;  %v615_v62 = vrot.slane %v601_v58, 4 }
 0x4e5   :  { %v610_v63 = vadd.f32 %v609_v59, %v600_v16  ;;  %v621_v0 = vrot.slane %v602_v60, 4 }
 0x4e6   :  { %v605_v2 = vrot.slane %v604_v61, 2  ;;  %v616_v3 = vadd.f32 %v615_v62, %v601_v58  ;;  %v1239_v58 = vld [vmem:[#allocation24] sm:$0xff]   ;;  %v1241_v62 = vld [vmem:[%s2124_s16] sm:$0xff]  }
 0x4e7   :  { %v611_v4 = vrot.slane %v610_v63, 2  ;;  %v622_v5 = vadd.f32 %v621_v0, %v602_v60  ;;  %v1240_v60 = vld [vmem:[#allocation24 + $0x8] sm:$0xff]   ;;  %1154 = vmatpush3.bf16.msra.mxu0 %v1241_v62  ;;  %v1099_v0 = vld [vmem:[#allocation22] ss:$0 sm:$0xff] }
 0x4e8   :  { %v606_v6 = vadd.f32 %v605_v2, %v604_v61  ;;  %v617_v7 = vrot.slane %v616_v3, 2  ;;  %v826_v61 = vpack.c.bf16 %v2008_v35, %v2006_v33  ;;  %1155 = vmatprep.subr.bf16.mxu0 %v1624_v1 }
 0x4e9   :  { %v623_v10 = vrot.slane %v622_v5, 2  ;;  %v612_v12 = vadd.f32 %v611_v4, %v610_v63  ;;  %v1242_v63 = vld [vmem:[%s2124_s16 + $0x8] sm:$0xff]  }
 0x4ea   :  { %v607_v11 = vrot.slane %v606_v6, 1  ;;  %v618_v13 = vadd.f32 %v617_v7, %v616_v3 }
 0x4eb   :  { %v624_v15 = vadd.f32 %v623_v10, %v622_v5  ;;  %v613_v20 = vrot.slane %v612_v12, 1  ;;  %1156 = vmatpush3.bf16.msra.mxu0 %v1242_v63 }
 0x4ec   :  { %v619_v17 = vrot.slane %v618_v13, 1  ;;  %v608_v19 = vadd.f32 %v607_v11, %v606_v6 }
 0x4ed   :  { %v625_v18 = vrot.slane %v624_v15, 1  ;;  %v614_v26 = vadd.f32 %v613_v20, %v612_v12  ;;  %v1107_v12 = vld [vmem:[%s2127_s19] ss:$0 sm:$0xff] }
 0x4ee   :  { %v620_v22 = vadd.f32 %v619_v17, %v618_v13  ;;  %v1103_v20 = vld [vmem:[%s2126_s18] ss:$0 sm:$0xff] }
 0x4ef   :  { %v626_v24 = vadd.f32 %v625_v18, %v624_v15 }
 0x4f0   :  { %v1202_v25 = vpack.i.bf16 %v620_v22, %v608_v19 }
 0x4f1   :  { %v1212_v27 = vpack.i.bf16 %v626_v24, %v614_v26 }
 0x4f2   :  { %1203 = vrot.lane.b32.xlu1 %v1202_v25, %s1609_s6  ;;  %1198 = vrot.lane.b32.xlu0 %v1202_v25, %s1626_s15 }
 0x4f6   :  { %1213 = vrot.lane.b32.xlu1 %v1212_v27, %s1626_s15  ;;  %1208 = vrot.lane.b32.xlu0 %v1202_v25, %s1627_s11 }
 0x4fa   :  { %1223 = vrot.lane.b32.xlu1 %v1212_v27, %s1627_s11  ;;  %1218 = vrot.lane.b32.xlu0 %v1212_v27, %s1609_s6 }
 0x564   :  { %v1204_v28 = vpop.permute.xlu1 %1203  ;;  %v1199_v29 = vpop.permute.xlu0 %1198 }
 0x565   :  { %v1201_v30 = vunpack.i.h.bf16 %v1199_v29  ;;  %v1200_v31 = vunpack.i.l.bf16 %v1199_v29  ;;  %v1206_v32 = vunpack.i.h.bf16 %v1204_v28  ;;  %v1205_v34 = vunpack.i.l.bf16 %v1204_v28 }
 0x567   :  { %v681_v36 = vsel %vm667_vm2, %v620_v22, %v1201_v30  ;;  %v668_v37 = vsel %vm667_vm2, %v608_v19, %v1200_v31 }
 0x568   :  { %v1214_v38 = vpop.permute.xlu1 %1213  ;;  %v1209_v39 = vpop.permute.xlu0 %1208  ;;  %v670_v42 = vsel %vm669_vm3, %v668_v37, %v1205_v34  ;;  %v682_v43 = vsel %vm669_vm3, %v681_v36, %v1206_v32 }
 0x569   :  { %v1211_v40 = vunpack.i.h.bf16 %v1209_v39  ;;  %v1210_v41 = vunpack.i.l.bf16 %v1209_v39  ;;  %v1216_v46 = vunpack.i.h.bf16 %v1214_v38  ;;  %v1215_v8 = vunpack.i.l.bf16 %v1214_v38 }
 0x56b   :  { %v672_v44 = vsel %vm671_vm4, %v670_v42, %v1210_v41  ;;  %v683_v45 = vsel %vm671_vm4, %v682_v43, %v1211_v40 }
 0x56c   :  { %v674_v47 = vsel %vm673_vm5, %v672_v44, %v614_v26  ;;  %v684_v48 = vsel %vm673_vm5, %v683_v45, %v626_v24  ;;  %v1224_v9 = vpop.permute.xlu1 %1223  ;;  %v1219_v49 = vpop.permute.xlu0 %1218 }
 0x56d   :  { %v1226_v50 = vunpack.i.h.bf16 %v1224_v9  ;;  %v1225_v51 = vunpack.i.l.bf16 %v1224_v9  ;;  %v1221_v52 = vunpack.i.h.bf16 %v1219_v49  ;;  %v1220_v53 = vunpack.i.l.bf16 %v1219_v49 }
 0x56e   :  { %v676_v54 = vsel %vm675_vm6, %v674_v47, %v1215_v8  ;;  %v685_v55 = vsel %vm675_vm6, %v684_v48, %v1216_v46 }
 0x56f   :  { %v678_v56 = vsel %vm677_vm7, %v676_v54, %v1220_v53  ;;  %v686_v16 = vsel %vm677_vm7, %v685_v55, %v1221_v52 }
 0x570   :  { %v680_v57 = vsel %vm679_vm8, %v678_v56, %v1225_v51  ;;  %v687_v21 = vsel %vm679_vm8, %v686_v16, %v1226_v50 }
 0x571   :  { %v688_v59 = vpack.c.bf16 %v687_v21, %v680_v57 }
 0x573   :  { %1150 = vmatmul.mubr.msk.bf16.vlgmr.msra.gmra.mrb[4].mxu1 %vm317_vm1, %v688_v59 }
 0x574   :  { %1162 = vmatpush3.bf16.msra.mxu1 %v1239_v58  ;;  %1165 = vmatprep.mubr.msk.bf16.mxu1 %vm1625_vm0, %v1624_v1  ;;  %v241_v58 = vld [vmem:[%s2149_s4] sm:$0xff] }
 0x575   :  { %1163 = vmatprep.subr.bf16.mxu1 %v1624_v1  ;;  %v954_v59 = vsub.f32 1.0, %v241_v58 }
 0x577   :  { %v956_v62 = vmul.f32 %v954_v59, %v2006_v33 }
 0x578   :  { %1164 = vmatpush3.bf16.msra.mxu1 %v1240_v60  ;;  %v242_v60 = vld [vmem:[%s2149_s4 + $0x8] sm:$0xff] }
 0x57b   :  { %1166 = vmatmul.mubr.msk.bf16.vlgmr.msra.gmra.mrb[8].mxu1 %vm317_vm1, %v826_v61 }
 0x646   :  { %v749_v2 = vpop.f32.mrb[4].mxu1 }
 0x647   :  { %v750_v3 = vadd.f32 %v1099_v0, %v749_v2  ;;  %v1151_v4 = vpop.f32.mrb[5].mxu1  ;;  %v955_v2 = vsub.f32 1.0, %v242_v60 }
 0x648   :  { %v752_v5 = vpop.f32.mrb[6].mxu1 }
 0x649   :  { %v753_v6 = vadd.f32 %v1099_v0, %v752_v5  ;;  %v1152_v7 = vpop.f32.mrb[7].mxu1  ;;  %v756_v10 = vmax.f32 %v750_v3, 0.0 }
 0x64a   :  { %v957_v7 = vmul.f32 %v955_v2, %v2008_v35 }
 0x64b   :  { %v757_v11 = vmax.f32 %v753_v6, 0.0 }
 0x64d   :  { %v758_v13 = vpack.c.bf16 %v757_v11, %v756_v10 }
 0x64e   :  { %v887_v1 = vpop.f32.mrb[8].mxu1 }
 0x64f   :  { %v888_v14 = vadd.f32 %v1107_v12, %v887_v1  ;;  %1158 = vmatmul.mubr.msk.bf16.vlgmr.msra.gmra.mrb[8].mxu0 %vm317_vm1, %v758_v13  ;;  %v1167_v15 = vpop.f32.mrb[9].mxu1 }
 0x650   :  { %v890_v17 = vpop.f32.mrb[10].mxu1 }
 0x651   :  { %v891_v18 = vadd.f32 %v1107_v12, %v890_v17  ;;  %910 = vrot.lane.b32.xlu1 %v888_v14, %s1609_s6  ;;  %v1168_v19 = vpop.f32.mrb[11].mxu1 }
 0x653   :  { %912 = vrot.lane.b32.xlu0 %v891_v18, %s1609_s6 }
 0x6c3   :  { %v911_v39 = vpop.permute.xlu1 %910 }
 0x6c5   :  { %v913_v42 = vpop.permute.xlu0 %912 }
 0x722   :  { %v819_v22 = vpop.f32.mrb[8].mxu0 }
 0x723   :  { %v820_v23 = vadd.f32 %v1103_v20, %v819_v22  ;;  %v1159_v24 = vpop.f32.mrb[9].mxu0 }
 0x724   :  { %v822_v25 = vpop.f32.mrb[10].mxu0 }
 0x725   :  { %v894_v26 = vadd.f32 %v888_v14, %v820_v23  ;;  %v823_v27 = vadd.f32 %v1103_v20, %v822_v25  ;;  %v1160_v28 = vpop.f32.mrb[11].mxu0 }
 0x727   :  { %v1111_v29 = vmul.f32 -1.442695, %v894_v26  ;;  %v895_v30 = vadd.f32 %v891_v18, %v823_v27 }
 0x729   :  { %1255 = vpow2.f32 %v1111_v29  ;;  %v1112_v31 = vmul.f32 -1.442695, %v895_v30 }
 0x72b   :  { %1257 = vpow2.f32 %v1112_v31 }
 0x733   :  { %v1256_v32 = vpop.eup %1255 }
 0x734   :  { %v902_v34 = vadd.f32 1.0, %v1256_v32 }
 0x735   :  { %v1258_v36 = vpop.eup %1257 }
 0x736   :  { %1259 = vrcp.f32 %v902_v34  ;;  %v903_v37 = vadd.f32 1.0, %v1258_v36 }
 0x738   :  { %1261 = vrcp.f32 %v903_v37 }
 0x740   :  { %v1260_v38 = vpop.eup %1259 }
 0x741   :  { %v916_v40 = vmul.f32 %v1260_v38, %v911_v39  ;;  %v930_v55 = vsub.f32 1.0, %v1260_v38 }
 0x742   :  { %v1262_v41 = vpop.eup %1261 }
 0x743   :  { %920 = vrot.lane.b32.xlu1 %v916_v40, %s1609_s6  ;;  %v917_v43 = vmul.f32 %v1262_v41, %v913_v42  ;;  %v931_v49 = vsub.f32 1.0, %v1262_v41 }
 0x745   :  { %922 = vrot.lane.b32.xlu0 %v917_v43, %s1609_s6 }
 0x747   :  { %946 = vrot.lane.b32.xlu1 %v2008_v35, %s1627_s11 }
 0x74b   :  { %944 = vrot.lane.b32.xlu1 %v2006_v33, %s1627_s11 }
 0x7b5   :  { %v921_v44 = vpop.permute.xlu1 %920 }
 0x7b6   :  { %v926_v8 = vadd.f32 %v921_v44, %v820_v23 }
 0x7b7   :  { %v923_v45 = vpop.permute.xlu0 %922 }
 0x7b8   :  { %v927_v46 = vadd.f32 %v923_v45, %v823_v27 }
 0x7b9   :  { %v947_v9 = vpop.permute.xlu1 %946 }
 0x7ba   :  { %1263 = vtanh.f32 %v927_v46  ;;  %v951_v51 = vmul.f32 %v1262_v41, %v947_v9 }
 0x7bb   :  { %1265 = vtanh.f32 %v926_v8 }
 0x7bd   :  { %v945_v53 = vpop.permute.xlu1 %944 }
 0x7be   :  { %v950_v16 = vmul.f32 %v1260_v38, %v945_v53 }
 0x7c4   :  { %v1264_v47 = vpop.eup %1263 }
 0x7c5   :  { %936 = vrot.lane.b32.xlu0 %v1264_v47, %s1626_s15  ;;  %v1266_v48 = vpop.eup %1265 }
 0x7c9   :  { %934 = vrot.lane.b32.xlu0 %v1266_v48, %s1626_s15 }
 0x837   :  { %v937_v50 = vpop.permute.xlu0 %936 }
 0x838   :  { %v941_v52 = vmul.f32 %v937_v50, %v931_v49 }
 0x83a   :  { %v953_v54 = vadd.f32 %v951_v51, %v941_v52 }
 0x83b   :  { %v935_v56 = vpop.permute.xlu0 %934 }
 0x83c   :  { %v940_v57 = vmul.f32 %v935_v56, %v930_v55  ;;  %962 = vrot.lane.b32.xlu0 %v953_v54, %s1626_s15 }
 0x83e   :  { %v952_v21 = vadd.f32 %v950_v16, %v940_v57 }
 0x840   :  { %960 = vrot.lane.b32.xlu1 %v952_v21, %s1626_s15 }
 0x8ae   :  { %v963_v0 = vpop.permute.xlu0 %962 }
 0x8af   :  { %v967_v4 = vmul.f32 %v963_v0, %v242_v60 }
 0x8b1   :  { %v969_v10 = vadd.f32 %v967_v4, %v957_v7 }
 0x8b2   :  { %v961_v61 = vpop.permute.xlu1 %960 }
 0x8b3   :  { %v966_v63 = vmul.f32 %v961_v61, %v241_v58  ;;  %v1020_v33 = vrot.slane %v969_v10, 5  ;;  %v1006_v13 = vrot.slane %v969_v10, 1  ;;  %v1024_v1 = vrot.slane %v969_v10, 6 }
 0x8b4   :  { %v1010_v14 = vrot.slane %v969_v10, 2  ;;  %v1028_v35 = vrot.slane %v969_v10, 7  ;;  %v1014_v15 = vrot.slane %v969_v10, 3  ;;  %v1018_v28 = vrot.slane %v969_v10, 4 }
 0x8b5   :  { %v968_v3 = vadd.f32 %v966_v63, %v956_v62 }
 0x8b7   :  { %v985_v5 = vrot.slane %v968_v3, 5  ;;  %v971_v6 = vrot.slane %v968_v3, 1  ;;  %v989_v11 = vrot.slane %v968_v3, 6  ;;  %v975_v12 = vrot.slane %v968_v3, 2 }
 0x8b8   :  { %v993_v17 = vrot.slane %v968_v3, 7  ;;  %v979_v18 = vrot.slane %v968_v3, 3  ;;  %v983_v37 = vrot.slane %v968_v3, 4 }
 0x8b9   :  { %986 = vrot.lane.b32.xlu1 %v985_v5, %s1627_s11  ;;  %972 = vrot.lane.b32.xlu0 %v971_v6, %s1627_s11 }
 0x8bd   :  { %990 = vrot.lane.b32.xlu1 %v989_v11, %s1609_s6  ;;  %976 = vrot.lane.b32.xlu0 %v975_v12, %s1609_s6 }
 0x8c1   :  { %1021 = vrot.lane.b32.xlu1 %v1020_v33, %s1627_s11  ;;  %1007 = vrot.lane.b32.xlu0 %v1006_v13, %s1627_s11 }
 0x8c5   :  { %1025 = vrot.lane.b32.xlu1 %v1024_v1, %s1609_s6  ;;  %1011 = vrot.lane.b32.xlu0 %v1010_v14, %s1609_s6  ;;  %s1628_s6 = smov [#allocation25]  }
 0x8c6   :  { %s1064_s21 = sshll.u32 %s1628_s6, 4  ;;  %s1065_s21 = int_to_ptr.vmem [resolvable:$true] %s1064_s21 }
 0x8c7   :  { %s1563_s29 = scalar_lea.vmem %s1065_s21, 64  ;;  %p1568_p10 = scmp.lt.s32.totalorder %s1065_s21, %s1065_s21 }
 0x8c8   :  { %p1564_p9 = scmp.ne.s32.totalorder %s1065_s21, %s1563_s29  ;;  %p1569_p11 = scmp.lt.s32.totalorder %s1563_s29, %s1563_s29 }
 0x8c9   :  { %1029 = vrot.lane.b32.xlu1 %v1028_v35, %s1626_s15  ;;  %1015 = vrot.lane.b32.xlu0 %v1014_v15, %s1626_s15 }
 0x8ca   :  { %p1570_p12 = por %p1569_p11, %p1568_p10 }
 0x8cc   :  { %p1571_p13 = pnand %p1570_p12, %p1564_p9 }
 0x8cd   :  { %994 = vrot.lane.b32.xlu1 %v993_v17, %s1626_s15  ;;  %980 = vrot.lane.b32.xlu0 %v979_v18, %s1626_s15 }
 0x92b   :  { %v987_v19 = vpop.permute.xlu1 %986  ;;  %v973_v20 = vpop.permute.xlu0 %972 }
 0x92c   :  { %v1002_v40 = vsel %vm317_vm1, %v983_v37, %v987_v19  ;;  %v997_v41 = vsel %vm317_vm1, %v968_v3, %v973_v20 }
 0x92f   :  { %v991_v22 = vpop.permute.xlu1 %990  ;;  %v977_v23 = vpop.permute.xlu0 %976 }
 0x930   :  { %v1003_v42 = vsel %vm998_vm10, %v1002_v40, %v991_v22  ;;  %v999_v43 = vsel %vm998_vm10, %v997_v41, %v977_v23 }
 0x933   :  { %v1022_v24 = vpop.permute.xlu1 %1021  ;;  %v1008_v25 = vpop.permute.xlu0 %1007 }
 0x934   :  { %v1035_v29 = vsel %vm317_vm1, %v1018_v28, %v1022_v24  ;;  %v1032_v30 = vsel %vm317_vm1, %v969_v10, %v1008_v25 }
 0x937   :  { %v1026_v26 = vpop.permute.xlu1 %1025  ;;  %v1012_v27 = vpop.permute.xlu0 %1011 }
 0x938   :  { %v1036_v31 = vsel %vm998_vm10, %v1035_v29, %v1026_v26  ;;  %v1033_v32 = vsel %vm998_vm10, %v1032_v30, %v1012_v27 }
 0x93b   :  { %v1030_v34 = vpop.permute.xlu1 %1029  ;;  %v1016_v36 = vpop.permute.xlu0 %1015 }
 0x93c   :  { %v1037_v38 = vsel %vm1000_vm9, %v1036_v31, %v1030_v34  ;;  %v1034_v39 = vsel %vm1000_vm9, %v1033_v32, %v1016_v36 }
 0x93d   :  { %v1041_v44 = vrot.slane %v1037_v38, 7  ;;  %v1040_v45 = vrot.slane %v1034_v39, 7 }
 0x93f   :  { %v995_v46 = vpop.permute.xlu1 %994  ;;  %v981_v8 = vpop.permute.xlu0 %980 }
 0x940   :  { %v1004_v47 = vsel %vm1000_vm9, %v1003_v42, %v995_v46  ;;  %v1001_v48 = vsel %vm1000_vm9, %v999_v43, %v981_v8 }
 0x941   :  { %v1045_v9 = vsel %vm667_vm2, %v1004_v47, %v1041_v44  ;;  %v1044_v49 = vsel %vm667_vm2, %v1001_v48, %v1040_v45 }
 0x942   :  { %v1048_v50 = vcombine.low %v1044_v49, %v1045_v9 }
 0x944   :  { %1113 = vst.sshfl [vmem:[#allocation25] sm:$0x33 pattern:$0x76325410] %v1048_v50 }
 0x945   :  { %1574 = shalt.err (!%p1571_p13)
}
 0x946   :  { %s1575_s27 = scalar_lea.hbm %s2128_s20, 64 }
 0x947   :  { %p1576_p0 = scmp.ne.s32.totalorder %s2128_s20, %s1575_s27  ;;  %p1579_p1 = scmp.lt.u32.totalorder %s1575_s27, %s2128_s20 }
 0x949   :  { %p1581_p2 = pnand %p1579_p1, %p1576_p0 }
 0x94b   :  { %1584 = shalt.err (!%p1581_p2)
}
 0x94c   :  { %1067 = dma.vmem_to_hbm [thread:$0]  %s1065_s21, 64, %s2128_s20, [#allocation6]  }
 0x94d   :  { %1601 = dma.done.wait [#allocation6], 64  }
 0x94e   :  { %1602 = vsyncadd [#allocation6], 4294967232 }
 0x94f   :  { %1071 = vsyncpa [#allocation5], 1 }
 0x950   :  { %1072 = vsyncpa [#allocation8], 1 }
 0x951   :  { %1073 = vsyncpa [#allocation11], 1 }
 0x952   :  { %1074 = vsyncpa [#allocation14], 1 }
 0x953   :  { %1075 = vsyncpa [#allocation17], 1 }
 0x954   :  { %1076 = vsyncpa [#allocation20], 1 }
 0x955   :  { %1077 = vsyncpa [#allocation23], 1 }
 0x956   :  { %1078 = vsyncpa [#allocation6], 1 }

</bundles_post_ra>
